<compile_context>
chip_gen: v7x
topology: tpu7x:2x2x1
jax: 0.10.0
libtpu: 0.0.40
codegen_flags: <defaults>
</compile_context>

<pallas_src>
import functools
import math

import jax
import jax.numpy as jnp
import numpy as np
from jax import lax
from jax.experimental import pallas as pl
from jax.experimental.pallas import tpu as pltpu

NUM_ITER = 5  # same as the PyTorch module


def _round_up(a, b):
    return (a + b - 1) // b * b


# ----------------------------------------------------------------------------
# Pallas kernel: one grid step soft-skeletonizes a packed, pre-stacked
# (2*T*H, Wp) tile (pred rows on top, one-hot rows below) and emits lane-dense
# per-column partial sums for the four clDice quantities.
# ----------------------------------------------------------------------------
def _cldice_kernel(z_ref, o_ref, *, seg_h, seg_w, half_rows):
    z = z_ref[...]                          # (R, Wp) f32: [pred tiles ; one-hot tiles]
    R, Wp = z.shape
    TH = half_rows                          # static: first half = pred, second = target

    # Boundary masks (static pattern, built once per grid step, reused by every
    # roll below).  TODO(synk): could be hoisted to a constant-index-map input,
    # but this iota/mod/cmp chain is only a few % of the per-step VALU work.
    rows = lax.broadcasted_iota(jnp.int32, (R, Wp), 0)
    cols = lax.broadcasted_iota(jnp.int32, (R, Wp), 1)
    rm = rows % seg_h
    cm = cols % seg_w
    row_first = rm == 0
    row_last = rm == seg_h - 1
    col_first = cm == 0
    col_last = cm == seg_w - 1

    # 3-window pools via XLU rolls + boundary fix-up.  Replacing the invalid
    # neighbor with the window center matches torch's implicit +/-inf padding
    # (min/max) and also blocks leakage across packed-slice boundaries.
    def pool_rows(a, op):
        up = jnp.where(row_first, a, pltpu.roll(a, 1, 0))       # a[r-1]
        dn = jnp.where(row_last, a, pltpu.roll(a, R - 1, 0))    # a[r+1]
        return op(op(up, dn), a)

    def pool_cols(a, op):
        lf = jnp.where(col_first, a, pltpu.roll(a, 1, 1))       # a[:, c-1]
        rt = jnp.where(col_last, a, pltpu.roll(a, Wp - 1, 1))   # a[:, c+1]
        return op(op(lf, rt), a)

    def erode(a):    # min over (3,1) and (1,3) windows
        return jnp.minimum(pool_rows(a, jnp.minimum), pool_cols(a, jnp.minimum))

    def dilate(a):   # separable 3x3 max
        return pool_cols(pool_rows(a, jnp.maximum), jnp.maximum)

    relu = lambda v: jnp.maximum(v, 0.0)

    # Soft skeleton with the duplicated erode CSE'd: every iteration computes
    # erode exactly once (open(img) = dilate(erode(img)); the next iteration's
    # `img = erode(img)` reuses that erode).  Bit-identical to the reference
    # recurrence, 6 erodes instead of 11.
    img = z
    e = erode(img)
    skel = relu(img - dilate(e))
    for _ in range(NUM_ITER):               # static unroll, NUM_ITER = 5
        img = e
        e = erode(img)
        delta = relu(img - dilate(e))
        skel = skel + relu(delta - skel * delta)

    skel_pred = skel[:TH]
    skel_true = skel[TH:]
    # Re-read the VMEM-resident inputs here instead of keeping them live across
    # the whole unrolled body (shorter live ranges, less vreg pressure).
    x = z_ref[pl.ds(0, TH), :]              # prediction
    y = z_ref[pl.ds(TH, TH), :]             # one-hot target

    # Lane-dense partial sums: fold sublane row-groups with plain VALU adds
    # (no cross-lane / sublane XLU reduction trees); the final reduction and
    # the clDice formula happen in the wrapper.
    def group_sum(a):                       # (TH, Wp) -> (8, Wp), TH % 8 == 0
        acc = a[0:8]
        for r0 in range(8, TH, 8):
            acc = acc + a[r0:r0 + 8]
        return acc

    o_ref[...] = jnp.concatenate(
        [
            group_sum(skel_pred * y),       # -> sum(skel_pred * y_onehot)
            group_sum(skel_pred),           # -> sum(skel_pred)
            group_sum(skel_true * x),       # -> sum(skel_true * x)
            group_sum(skel_true),           # -> sum(skel_true)
        ],
        axis=0,
    )                                       # one unmasked lane-dense (32, Wp) store


# ----------------------------------------------------------------------------
# Wrapper: matches SoftClDiceLoss.forward (loss_mask unsupported, as in torch).
# ----------------------------------------------------------------------------
def soft_cl_dice_loss(x, y, smooth=1.0, do_bg=True, apply_nonlin=None):
    if apply_nonlin is not None:
        x = apply_nonlin(x)
    x = x.astype(jnp.float32)

    # ---- target preparation (matches the torch.no_grad() block) ----
    if y.ndim != x.ndim:
        y = y.reshape((y.shape[0], 1) + y.shape[1:])
    if x.shape == y.shape:
        y_onehot = y.astype(jnp.float32)
    else:
        y_onehot = jax.nn.one_hot(
            y[:, 0].astype(jnp.int32), x.shape[1], axis=1, dtype=jnp.float32
        )
    if not do_bg:
        y_onehot = y_onehot[:, 1:]
        x = x[:, 1:]

    # TODO(synk): 3-D (NCDHW) volumes and loss_mask are not supported by this
    # 2-D kernel (the torch module raises for loss_mask anyway).
    B, C, H, W = x.shape
    N = B * C
    smooth = jnp.float32(smooth)

    if N == 0:  # do_bg=False with a single channel -> empty foreground
        zero = jnp.float32(0.0)
        tprec = (zero + smooth) / (zero + smooth)
        tsens = tprec
        return -2.0 * (tprec * tsens) / (tprec + tsens)

    xf = x.reshape(N, H, W)
    yf = y_onehot.reshape(N, H, W)

    # ---- lane packing: KL slices side by side so Wp = KL*W is a multiple of
    #      128 whenever enough slices exist (full lane occupancy) ----
    if W % 128 == 0:
        KL = 1
    elif W < 128:
        kl_full = math.lcm(W, 128) // W
        KL = kl_full if N >= kl_full else max(1, 128 // W)
    else:
        KL = 1
    Np = _round_up(N, KL)
    if Np != N:  # all-zero padded slices contribute exactly 0 to every sum
        pad = ((0, Np - N), (0, 0), (0, 0))
        xf = jnp.pad(xf, pad)
        yf = jnp.pad(yf, pad)
    G = Np // KL
    Wp = KL * W
    xf = xf.reshape(G, KL, H, W).transpose(0, 2, 1, 3).reshape(G, H, Wp)
    yf = yf.reshape(G, KL, H, W).transpose(0, 2, 1, 3).reshape(G, H, Wp)

    # ---- per-generation VMEM budget (v7x: 64 MiB physical, v5e/v6e: 128) ----
    try:
        vmem_cap = int(pltpu.get_tpu_info().vmem_capacity_bytes)
    except Exception:  # be conservative if the query is unavailable
        vmem_cap = 64 * 1024 * 1024
    small_vmem = vmem_cap <= 64 * 1024 * 1024
    half_tile_budget = (768 if small_vmem else 1536) * 1024   # per x (or y) half-tile
    vmem_limit = int(min(3 * vmem_cap // 4, 96 * 1024 * 1024))

    # ---- fold T packed groups per grid step along the sublane axis ----
    t_unit = 8 // math.gcd(H, 8)                 # keeps block rows % 8 == 0
    half_bytes = H * Wp * 4
    T_cap = max(t_unit, (half_tile_budget // half_bytes) // t_unit * t_unit)
    T = min(T_cap, _round_up(G, t_unit))
    if G >= 2 * t_unit:
        # keep grid >= 2 so the "parallel" axis can shard across v7x's 2 TCs
        T = min(T, _round_up((G + 1) // 2, t_unit))
    T = max(T, t_unit)
    Gp = _round_up(G, T)
    if Gp != G:
        pad = ((0, Gp - G), (0, 0), (0, 0))
        xf = jnp.pad(xf, pad)
        yf = jnp.pad(yf, pad)
    grid = Gp // T
    TH = T * H

    # Pre-stack prediction and one-hot target per grid tile: one input stream,
    # rows [0, TH) = pred, [TH, 2*TH) = target (no in-kernel concatenate).
    xg = xf.reshape(grid, TH, Wp)
    yg = yf.reshape(grid, TH, Wp)
    z2d = jnp.concatenate([xg, yg], axis=1).reshape(grid * 2 * TH, Wp)

    kern = functools.partial(_cldice_kernel, seg_h=H, seg_w=W, half_rows=TH)
    out = pl.pallas_call(
        kern,
        out_shape=jax.ShapeDtypeStruct((grid * 32, Wp), jnp.float32),
        grid_spec=pltpu.PrefetchScalarGridSpec(
            num_scalar_prefetch=0,
            grid=(grid,),
            in_specs=[pl.BlockSpec((2 * TH, Wp), lambda i: (i, 0))],
            out_specs=pl.BlockSpec((32, Wp), lambda i: (i, 0)),
        ),
        compiler_params=pltpu.CompilerParams(
            dimension_semantics=("parallel",),
            vmem_limit_bytes=vmem_limit,
        ),
    )(z2d)

    # Final reduction + clDice formula on the tiny per-step partial sums.
    psums = out.reshape(grid, 4, 8, Wp)
    s_py = jnp.sum(psums[:, 0])
    s_p = jnp.sum(psums[:, 1])
    s_tx = jnp.sum(psums[:, 2])
    s_t = jnp.sum(psums[:, 3])
    tprec = (s_py + smooth) / (s_p + smooth)
    tsens = (s_tx + smooth) / (s_t + smooth)
    return -2.0 * (tprec * tsens) / (tprec + tsens)


# ----------------------------------------------------------------------------
# Pure-JAX reference (mirrors the PyTorch code with lax.reduce_window).
# ----------------------------------------------------------------------------
def _ref_maxpool(img, window, padding):
    return lax.reduce_window(
        img,
        -jnp.inf,
        lax.max,
        (1, 1) + window,
        (1, 1, 1, 1),
        [(0, 0), (0, 0), (padding[0], padding[0]), (padding[1], padding[1])],
    )


def _ref_soft_erode(img):
    p1 = -_ref_maxpool(-img, (3, 1), (1, 0))
    p2 = -_ref_maxpool(-img, (1, 3), (0, 1))
    return jnp.minimum(p1, p2)


def _ref_soft_dilate(img):
    return _ref_maxpool(img, (3, 3), (1, 1))


def _ref_soft_open(img):
    return _ref_soft_dilate(_ref_soft_erode(img))


def _ref_soft_skel(img, num_iter):
    img1 = _ref_soft_open(img)
    skel = jax.nn.relu(img - img1)
    for _ in range(num_iter):
        img = _ref_soft_erode(img)
        img1 = _ref_soft_open(img)
        delta = jax.nn.relu(img - img1)
        skel = skel + jax.nn.relu(delta - skel * delta)
    return skel


def ref_soft_cl_dice_loss(x, y_onehot, smooth=1.0):
    skel_pred = _ref_soft_skel(x, NUM_ITER)
    skel_true = _ref_soft_skel(y_onehot, NUM_ITER)
    tprec = (jnp.sum(skel_pred * y_onehot) + smooth) / (jnp.sum(skel_pred) + smooth)
    tsens = (jnp.sum(skel_true * x) + smooth) / (jnp.sum(skel_true) + smooth)
    return -2.0 * (tprec * tsens) / (tprec + tsens)


if __name__ == "__main__":
    key = jax.random.PRNGKey(0)
    k1, k2, k3, k4 = jax.random.split(key, 4)

    # Case 1: integer labels, do_bg=True.
    B, C, H, W = 2, 4, 16, 16
    logits = jax.random.normal(k1, (B, C, H, W), dtype=jnp.float32)
    x = jax.nn.softmax(logits, axis=1)            # prediction probabilities
    y = jax.random.randint(k2, (B, H, W), 0, C)   # integer labels
    loss = jax.block_until_ready(soft_cl_dice_loss(x, y, smooth=1.0, do_bg=True))
    y_onehot = jax.nn.one_hot(y, C, axis=1, dtype=jnp.float32)
    ref = jax.block_until_ready(ref_soft_cl_dice_loss(x, y_onehot, smooth=1.0))
    np.testing.assert_allclose(np.asarray(loss), np.asarray(ref), rtol=1e-5, atol=1e-5)

    # Case 2: one-hot float target (same shape as x), do_bg=False.
    B2, C2, H2, W2 = 1, 3, 8, 16
    logits2 = jax.random.normal(k3, (B2, C2, H2, W2), dtype=jnp.float32)
    x2 = jax.nn.softmax(logits2, axis=1)
    y2 = jax.nn.one_hot(jax.random.randint(k4, (B2, H2, W2), 0, C2), C2,
                        axis=1, dtype=jnp.float32)
    loss2 = jax.block_until_ready(soft_cl_dice_loss(x2, y2, smooth=1.0, do_bg=False))
    ref2 = jax.block_until_ready(
        ref_soft_cl_dice_loss(x2[:, 1:], y2[:, 1:], smooth=1.0))
    np.testing.assert_allclose(np.asarray(loss2), np.asarray(ref2), rtol=1e-5, atol=1e-5)

    print("KERNEL_OK")
</pallas_src>

<mosaic_0001>
module attributes {stable_mosaic.version = 11 : i64} {
  func.func @_cldice_kernel(%arg0: i32, %arg1: memref<32x128xf32, #tpu.memory_space<vmem>>, %arg2: memref<32x128xf32, #tpu.memory_space<vmem>>) attributes {dimension_semantics = [#tpu.dimension_semantics<parallel>], iteration_bounds = array<i64: 1>, scalar_prefetch = 0 : i64, scratch_operands = 0 : i64, tpu.core_type = #tpu.core_type<tc>, window_params = [{transform_indices = @transform_0, window_bounds = array<i64: 32, 128>}, {transform_indices = @transform_1, window_bounds = array<i64: 32, 128>}]} {
    %c0 = arith.constant 0 : index
    %c0_0 = arith.constant 0 : index
    %0 = vector.load %arg1[%c0, %c0_0] : memref<32x128xf32, #tpu.memory_space<vmem>>, vector<32x128xf32>
    %1 = tpu.iota {dimensions = array<i32: 0>} : vector<32x128xi32>
    %2 = tpu.iota {dimensions = array<i32: 1>} : vector<32x128xi32>
    %c16_i32 = arith.constant 16 : i32
    %c0_i32 = arith.constant 0 : i32
    %3 = arith.cmpi eq, %c16_i32, %c0_i32 : i32
    %c1_i32 = arith.constant 1 : i32
    %4 = arith.select %3, %c1_i32, %c16_i32 : i32
    %5 = vector.broadcast %4 : i32 to vector<32x128xi32>
    %6 = arith.remsi %1, %5 : vector<32x128xi32>
    %c0_i32_1 = arith.constant 0 : i32
    %7 = vector.broadcast %c0_i32_1 : i32 to vector<32x128xi32>
    %8 = arith.cmpi ne, %6, %7 : vector<32x128xi32>
    %c0_i32_2 = arith.constant 0 : i32
    %9 = vector.broadcast %c0_i32_2 : i32 to vector<32x128xi32>
    %10 = arith.cmpi slt, %6, %9 : vector<32x128xi32>
    %c0_i32_3 = arith.constant 0 : i32
    %11 = arith.cmpi slt, %4, %c0_i32_3 : i32
    %12 = vector.broadcast %11 : i1 to vector<32x128xi1>
    %13 = vector.broadcast %12 : vector<32x128xi1> to vector<32x128xi1>
    %14 = arith.xori %10, %13 : vector<32x128xi1>
    %15 = arith.andi %14, %8 : vector<32x128xi1>
    %16 = vector.broadcast %4 : i32 to vector<32x128xi32>
    %17 = arith.addi %6, %16 : vector<32x128xi32>
    %18 = arith.select %15, %17, %6 : vector<32x128xi1>, vector<32x128xi32>
    %c16_i32_4 = arith.constant 16 : i32
    %c0_i32_5 = arith.constant 0 : i32
    %19 = arith.cmpi eq, %c16_i32_4, %c0_i32_5 : i32
    %c1_i32_6 = arith.constant 1 : i32
    %20 = arith.select %19, %c1_i32_6, %c16_i32_4 : i32
    %21 = vector.broadcast %20 : i32 to vector<32x128xi32>
    %22 = arith.remsi %2, %21 : vector<32x128xi32>
    %c0_i32_7 = arith.constant 0 : i32
    %23 = vector.broadcast %c0_i32_7 : i32 to vector<32x128xi32>
    %24 = arith.cmpi ne, %22, %23 : vector<32x128xi32>
    %c0_i32_8 = arith.constant 0 : i32
    %25 = vector.broadcast %c0_i32_8 : i32 to vector<32x128xi32>
    %26 = arith.cmpi slt, %22, %25 : vector<32x128xi32>
    %c0_i32_9 = arith.constant 0 : i32
    %27 = arith.cmpi slt, %20, %c0_i32_9 : i32
    %28 = vector.broadcast %27 : i1 to vector<32x128xi1>
    %29 = vector.broadcast %28 : vector<32x128xi1> to vector<32x128xi1>
    %30 = arith.xori %26, %29 : vector<32x128xi1>
    %31 = arith.andi %30, %24 : vector<32x128xi1>
    %32 = vector.broadcast %20 : i32 to vector<32x128xi32>
    %33 = arith.addi %22, %32 : vector<32x128xi32>
    %34 = arith.select %31, %33, %22 : vector<32x128xi1>, vector<32x128xi32>
    %c0_i32_10 = arith.constant 0 : i32
    %35 = vector.broadcast %c0_i32_10 : i32 to vector<32x128xi32>
    %36 = arith.cmpi eq, %18, %35 : vector<32x128xi32>
    %c15_i32 = arith.constant 15 : i32
    %37 = vector.broadcast %c15_i32 : i32 to vector<32x128xi32>
    %38 = arith.cmpi eq, %18, %37 : vector<32x128xi32>
    %c0_i32_11 = arith.constant 0 : i32
    %39 = vector.broadcast %c0_i32_11 : i32 to vector<32x128xi32>
    %40 = arith.cmpi eq, %34, %39 : vector<32x128xi32>
    %c15_i32_12 = arith.constant 15 : i32
    %41 = vector.broadcast %c15_i32_12 : i32 to vector<32x128xi32>
    %42 = arith.cmpi eq, %34, %41 : vector<32x128xi32>
    %c1_i32_13 = arith.constant 1 : i32
    %43 = tpu.dynamic_rotate %0 by %c1_i32_13 dim 0 : vector<32x128xf32>, i32 -> vector<32x128xf32>
    %44 = arith.select %36, %0, %43 : vector<32x128xi1>, vector<32x128xf32>
    %c31_i32 = arith.constant 31 : i32
    %45 = tpu.dynamic_rotate %0 by %c31_i32 dim 0 : vector<32x128xf32>, i32 -> vector<32x128xf32>
    %46 = arith.select %38, %0, %45 : vector<32x128xi1>, vector<32x128xf32>
    %47 = arith.minimumf %44, %46 : vector<32x128xf32>
    %48 = arith.minimumf %47, %0 : vector<32x128xf32>
    %c1_i32_14 = arith.constant 1 : i32
    %49 = tpu.dynamic_rotate %0 by %c1_i32_14 dim 1 : vector<32x128xf32>, i32 -> vector<32x128xf32>
    %50 = arith.select %40, %0, %49 : vector<32x128xi1>, vector<32x128xf32>
    %c127_i32 = arith.constant 127 : i32
    %51 = tpu.dynamic_rotate %0 by %c127_i32 dim 1 : vector<32x128xf32>, i32 -> vector<32x128xf32>
    %52 = arith.select %42, %0, %51 : vector<32x128xi1>, vector<32x128xf32>
    %53 = arith.minimumf %50, %52 : vector<32x128xf32>
    %54 = arith.minimumf %53, %0 : vector<32x128xf32>
    %55 = arith.minimumf %48, %54 : vector<32x128xf32>
    %c1_i32_15 = arith.constant 1 : i32
    %56 = tpu.dynamic_rotate %55 by %c1_i32_15 dim 0 : vector<32x128xf32>, i32 -> vector<32x128xf32>
    %57 = arith.select %36, %55, %56 : vector<32x128xi1>, vector<32x128xf32>
    %c31_i32_16 = arith.constant 31 : i32
    %58 = tpu.dynamic_rotate %55 by %c31_i32_16 dim 0 : vector<32x128xf32>, i32 -> vector<32x128xf32>
    %59 = arith.select %38, %55, %58 : vector<32x128xi1>, vector<32x128xf32>
    %60 = arith.maximumf %57, %59 : vector<32x128xf32>
    %61 = arith.maximumf %60, %55 : vector<32x128xf32>
    %c1_i32_17 = arith.constant 1 : i32
    %62 = tpu.dynamic_rotate %61 by %c1_i32_17 dim 1 : vector<32x128xf32>, i32 -> vector<32x128xf32>
    %63 = arith.select %40, %61, %62 : vector<32x128xi1>, vector<32x128xf32>
    %c127_i32_18 = arith.constant 127 : i32
    %64 = tpu.dynamic_rotate %61 by %c127_i32_18 dim 1 : vector<32x128xf32>, i32 -> vector<32x128xf32>
    %65 = arith.select %42, %61, %64 : vector<32x128xi1>, vector<32x128xf32>
    %66 = arith.maximumf %63, %65 : vector<32x128xf32>
    %67 = arith.maximumf %66, %61 : vector<32x128xf32>
    %68 = arith.subf %0, %67 : vector<32x128xf32>
    %cst = arith.constant 0.000000e+00 : f32
    %69 = vector.broadcast %cst : f32 to vector<32x128xf32>
    %70 = arith.maximumf %68, %69 : vector<32x128xf32>
    %c1_i32_19 = arith.constant 1 : i32
    %71 = tpu.dynamic_rotate %55 by %c1_i32_19 dim 0 : vector<32x128xf32>, i32 -> vector<32x128xf32>
    %72 = arith.select %36, %55, %71 : vector<32x128xi1>, vector<32x128xf32>
    %c31_i32_20 = arith.constant 31 : i32
    %73 = tpu.dynamic_rotate %55 by %c31_i32_20 dim 0 : vector<32x128xf32>, i32 -> vector<32x128xf32>
    %74 = arith.select %38, %55, %73 : vector<32x128xi1>, vector<32x128xf32>
    %75 = arith.minimumf %72, %74 : vector<32x128xf32>
    %76 = arith.minimumf %75, %55 : vector<32x128xf32>
    %c1_i32_21 = arith.constant 1 : i32
    %77 = tpu.dynamic_rotate %55 by %c1_i32_21 dim 1 : vector<32x128xf32>, i32 -> vector<32x128xf32>
    %78 = arith.select %40, %55, %77 : vector<32x128xi1>, vector<32x128xf32>
    %c127_i32_22 = arith.constant 127 : i32
    %79 = tpu.dynamic_rotate %55 by %c127_i32_22 dim 1 : vector<32x128xf32>, i32 -> vector<32x128xf32>
    %80 = arith.select %42, %55, %79 : vector<32x128xi1>, vector<32x128xf32>
    %81 = arith.minimumf %78, %80 : vector<32x128xf32>
    %82 = arith.minimumf %81, %55 : vector<32x128xf32>
    %83 = arith.minimumf %76, %82 : vector<32x128xf32>
    %c1_i32_23 = arith.constant 1 : i32
    %84 = tpu.dynamic_rotate %83 by %c1_i32_23 dim 0 : vector<32x128xf32>, i32 -> vector<32x128xf32>
    %85 = arith.select %36, %83, %84 : vector<32x128xi1>, vector<32x128xf32>
    %c31_i32_24 = arith.constant 31 : i32
    %86 = tpu.dynamic_rotate %83 by %c31_i32_24 dim 0 : vector<32x128xf32>, i32 -> vector<32x128xf32>
    %87 = arith.select %38, %83, %86 : vector<32x128xi1>, vector<32x128xf32>
    %88 = arith.maximumf %85, %87 : vector<32x128xf32>
    %89 = arith.maximumf %88, %83 : vector<32x128xf32>
    %c1_i32_25 = arith.constant 1 : i32
    %90 = tpu.dynamic_rotate %89 by %c1_i32_25 dim 1 : vector<32x128xf32>, i32 -> vector<32x128xf32>
    %91 = arith.select %40, %89, %90 : vector<32x128xi1>, vector<32x128xf32>
    %c127_i32_26 = arith.constant 127 : i32
    %92 = tpu.dynamic_rotate %89 by %c127_i32_26 dim 1 : vector<32x128xf32>, i32 -> vector<32x128xf32>
    %93 = arith.select %42, %89, %92 : vector<32x128xi1>, vector<32x128xf32>
    %94 = arith.maximumf %91, %93 : vector<32x128xf32>
    %95 = arith.maximumf %94, %89 : vector<32x128xf32>
    %96 = arith.subf %55, %95 : vector<32x128xf32>
    %cst_27 = arith.constant 0.000000e+00 : f32
    %97 = vector.broadcast %cst_27 : f32 to vector<32x128xf32>
    %98 = arith.maximumf %96, %97 : vector<32x128xf32>
    %99 = arith.mulf %70, %98 : vector<32x128xf32>
    %100 = arith.subf %98, %99 : vector<32x128xf32>
    %cst_28 = arith.constant 0.000000e+00 : f32
    %101 = vector.broadcast %cst_28 : f32 to vector<32x128xf32>
    %102 = arith.maximumf %100, %101 : vector<32x128xf32>
    %103 = arith.addf %70, %102 : vector<32x128xf32>
    %c1_i32_29 = arith.constant 1 : i32
    %104 = tpu.dynamic_rotate %83 by %c1_i32_29 dim 0 : vector<32x128xf32>, i32 -> vector<32x128xf32>
    %105 = arith.select %36, %83, %104 : vector<32x128xi1>, vector<32x128xf32>
    %c31_i32_30 = arith.constant 31 : i32
    %106 = tpu.dynamic_rotate %83 by %c31_i32_30 dim 0 : vector<32x128xf32>, i32 -> vector<32x128xf32>
    %107 = arith.select %38, %83, %106 : vector<32x128xi1>, vector<32x128xf32>
    %108 = arith.minimumf %105, %107 : vector<32x128xf32>
    %109 = arith.minimumf %108, %83 : vector<32x128xf32>
    %c1_i32_31 = arith.constant 1 : i32
    %110 = tpu.dynamic_rotate %83 by %c1_i32_31 dim 1 : vector<32x128xf32>, i32 -> vector<32x128xf32>
    %111 = arith.select %40, %83, %110 : vector<32x128xi1>, vector<32x128xf32>
    %c127_i32_32 = arith.constant 127 : i32
    %112 = tpu.dynamic_rotate %83 by %c127_i32_32 dim 1 : vector<32x128xf32>, i32 -> vector<32x128xf32>
    %113 = arith.select %42, %83, %112 : vector<32x128xi1>, vector<32x128xf32>
    %114 = arith.minimumf %111, %113 : vector<32x128xf32>
    %115 = arith.minimumf %114, %83 : vector<32x128xf32>
    %116 = arith.minimumf %109, %115 : vector<32x128xf32>
    %c1_i32_33 = arith.constant 1 : i32
    %117 = tpu.dynamic_rotate %116 by %c1_i32_33 dim 0 : vector<32x128xf32>, i32 -> vector<32x128xf32>
    %118 = arith.select %36, %116, %117 : vector<32x128xi1>, vector<32x128xf32>
    %c31_i32_34 = arith.constant 31 : i32
    %119 = tpu.dynamic_rotate %116 by %c31_i32_34 dim 0 : vector<32x128xf32>, i32 -> vector<32x128xf32>
    %120 = arith.select %38, %116, %119 : vector<32x128xi1>, vector<32x128xf32>
    %121 = arith.maximumf %118, %120 : vector<32x128xf32>
    %122 = arith.maximumf %121, %116 : vector<32x128xf32>
    %c1_i32_35 = arith.constant 1 : i32
    %123 = tpu.dynamic_rotate %122 by %c1_i32_35 dim 1 : vector<32x128xf32>, i32 -> vector<32x128xf32>
    %124 = arith.select %40, %122, %123 : vector<32x128xi1>, vector<32x128xf32>
    %c127_i32_36 = arith.constant 127 : i32
    %125 = tpu.dynamic_rotate %122 by %c127_i32_36 dim 1 : vector<32x128xf32>, i32 -> vector<32x128xf32>
    %126 = arith.select %42, %122, %125 : vector<32x128xi1>, vector<32x128xf32>
    %127 = arith.maximumf %124, %126 : vector<32x128xf32>
    %128 = arith.maximumf %127, %122 : vector<32x128xf32>
    %129 = arith.subf %83, %128 : vector<32x128xf32>
    %cst_37 = arith.constant 0.000000e+00 : f32
    %130 = vector.broadcast %cst_37 : f32 to vector<32x128xf32>
    %131 = arith.maximumf %129, %130 : vector<32x128xf32>
    %132 = arith.mulf %103, %131 : vector<32x128xf32>
    %133 = arith.subf %131, %132 : vector<32x128xf32>
    %cst_38 = arith.constant 0.000000e+00 : f32
    %134 = vector.broadcast %cst_38 : f32 to vector<32x128xf32>
    %135 = arith.maximumf %133, %134 : vector<32x128xf32>
    %136 = arith.addf %103, %135 : vector<32x128xf32>
    %c1_i32_39 = arith.constant 1 : i32
    %137 = tpu.dynamic_rotate %116 by %c1_i32_39 dim 0 : vector<32x128xf32>, i32 -> vector<32x128xf32>
    %138 = arith.select %36, %116, %137 : vector<32x128xi1>, vector<32x128xf32>
    %c31_i32_40 = arith.constant 31 : i32
    %139 = tpu.dynamic_rotate %116 by %c31_i32_40 dim 0 : vector<32x128xf32>, i32 -> vector<32x128xf32>
    %140 = arith.select %38, %116, %139 : vector<32x128xi1>, vector<32x128xf32>
    %141 = arith.minimumf %138, %140 : vector<32x128xf32>
    %142 = arith.minimumf %141, %116 : vector<32x128xf32>
    %c1_i32_41 = arith.constant 1 : i32
    %143 = tpu.dynamic_rotate %116 by %c1_i32_41 dim 1 : vector<32x128xf32>, i32 -> vector<32x128xf32>
    %144 = arith.select %40, %116, %143 : vector<32x128xi1>, vector<32x128xf32>
    %c127_i32_42 = arith.constant 127 : i32
    %145 = tpu.dynamic_rotate %116 by %c127_i32_42 dim 1 : vector<32x128xf32>, i32 -> vector<32x128xf32>
    %146 = arith.select %42, %116, %145 : vector<32x128xi1>, vector<32x128xf32>
    %147 = arith.minimumf %144, %146 : vector<32x128xf32>
    %148 = arith.minimumf %147, %116 : vector<32x128xf32>
    %149 = arith.minimumf %142, %148 : vector<32x128xf32>
    %c1_i32_43 = arith.constant 1 : i32
    %150 = tpu.dynamic_rotate %149 by %c1_i32_43 dim 0 : vector<32x128xf32>, i32 -> vector<32x128xf32>
    %151 = arith.select %36, %149, %150 : vector<32x128xi1>, vector<32x128xf32>
    %c31_i32_44 = arith.constant 31 : i32
    %152 = tpu.dynamic_rotate %149 by %c31_i32_44 dim 0 : vector<32x128xf32>, i32 -> vector<32x128xf32>
    %153 = arith.select %38, %149, %152 : vector<32x128xi1>, vector<32x128xf32>
    %154 = arith.maximumf %151, %153 : vector<32x128xf32>
    %155 = arith.maximumf %154, %149 : vector<32x128xf32>
    %c1_i32_45 = arith.constant 1 : i32
    %156 = tpu.dynamic_rotate %155 by %c1_i32_45 dim 1 : vector<32x128xf32>, i32 -> vector<32x128xf32>
    %157 = arith.select %40, %155, %156 : vector<32x128xi1>, vector<32x128xf32>
    %c127_i32_46 = arith.constant 127 : i32
    %158 = tpu.dynamic_rotate %155 by %c127_i32_46 dim 1 : vector<32x128xf32>, i32 -> vector<32x128xf32>
    %159 = arith.select %42, %155, %158 : vector<32x128xi1>, vector<32x128xf32>
    %160 = arith.maximumf %157, %159 : vector<32x128xf32>
    %161 = arith.maximumf %160, %155 : vector<32x128xf32>
    %162 = arith.subf %116, %161 : vector<32x128xf32>
    %cst_47 = arith.constant 0.000000e+00 : f32
    %163 = vector.broadcast %cst_47 : f32 to vector<32x128xf32>
    %164 = arith.maximumf %162, %163 : vector<32x128xf32>
    %165 = arith.mulf %136, %164 : vector<32x128xf32>
    %166 = arith.subf %164, %165 : vector<32x128xf32>
    %cst_48 = arith.constant 0.000000e+00 : f32
    %167 = vector.broadcast %cst_48 : f32 to vector<32x128xf32>
    %168 = arith.maximumf %166, %167 : vector<32x128xf32>
    %169 = arith.addf %136, %168 : vector<32x128xf32>
    %c1_i32_49 = arith.constant 1 : i32
    %170 = tpu.dynamic_rotate %149 by %c1_i32_49 dim 0 : vector<32x128xf32>, i32 -> vector<32x128xf32>
    %171 = arith.select %36, %149, %170 : vector<32x128xi1>, vector<32x128xf32>
    %c31_i32_50 = arith.constant 31 : i32
    %172 = tpu.dynamic_rotate %149 by %c31_i32_50 dim 0 : vector<32x128xf32>, i32 -> vector<32x128xf32>
    %173 = arith.select %38, %149, %172 : vector<32x128xi1>, vector<32x128xf32>
    %174 = arith.minimumf %171, %173 : vector<32x128xf32>
    %175 = arith.minimumf %174, %149 : vector<32x128xf32>
    %c1_i32_51 = arith.constant 1 : i32
    %176 = tpu.dynamic_rotate %149 by %c1_i32_51 dim 1 : vector<32x128xf32>, i32 -> vector<32x128xf32>
    %177 = arith.select %40, %149, %176 : vector<32x128xi1>, vector<32x128xf32>
    %c127_i32_52 = arith.constant 127 : i32
    %178 = tpu.dynamic_rotate %149 by %c127_i32_52 dim 1 : vector<32x128xf32>, i32 -> vector<32x128xf32>
    %179 = arith.select %42, %149, %178 : vector<32x128xi1>, vector<32x128xf32>
    %180 = arith.minimumf %177, %179 : vector<32x128xf32>
    %181 = arith.minimumf %180, %149 : vector<32x128xf32>
    %182 = arith.minimumf %175, %181 : vector<32x128xf32>
    %c1_i32_53 = arith.constant 1 : i32
    %183 = tpu.dynamic_rotate %182 by %c1_i32_53 dim 0 : vector<32x128xf32>, i32 -> vector<32x128xf32>
    %184 = arith.select %36, %182, %183 : vector<32x128xi1>, vector<32x128xf32>
    %c31_i32_54 = arith.constant 31 : i32
    %185 = tpu.dynamic_rotate %182 by %c31_i32_54 dim 0 : vector<32x128xf32>, i32 -> vector<32x128xf32>
    %186 = arith.select %38, %182, %185 : vector<32x128xi1>, vector<32x128xf32>
    %187 = arith.maximumf %184, %186 : vector<32x128xf32>
    %188 = arith.maximumf %187, %182 : vector<32x128xf32>
    %c1_i32_55 = arith.constant 1 : i32
    %189 = tpu.dynamic_rotate %188 by %c1_i32_55 dim 1 : vector<32x128xf32>, i32 -> vector<32x128xf32>
    %190 = arith.select %40, %188, %189 : vector<32x128xi1>, vector<32x128xf32>
    %c127_i32_56 = arith.constant 127 : i32
    %191 = tpu.dynamic_rotate %188 by %c127_i32_56 dim 1 : vector<32x128xf32>, i32 -> vector<32x128xf32>
    %192 = arith.select %42, %188, %191 : vector<32x128xi1>, vector<32x128xf32>
    %193 = arith.maximumf %190, %192 : vector<32x128xf32>
    %194 = arith.maximumf %193, %188 : vector<32x128xf32>
    %195 = arith.subf %149, %194 : vector<32x128xf32>
    %cst_57 = arith.constant 0.000000e+00 : f32
    %196 = vector.broadcast %cst_57 : f32 to vector<32x128xf32>
    %197 = arith.maximumf %195, %196 : vector<32x128xf32>
    %198 = arith.mulf %169, %197 : vector<32x128xf32>
    %199 = arith.subf %197, %198 : vector<32x128xf32>
    %cst_58 = arith.constant 0.000000e+00 : f32
    %200 = vector.broadcast %cst_58 : f32 to vector<32x128xf32>
    %201 = arith.maximumf %199, %200 : vector<32x128xf32>
    %202 = arith.addf %169, %201 : vector<32x128xf32>
    %c1_i32_59 = arith.constant 1 : i32
    %203 = tpu.dynamic_rotate %182 by %c1_i32_59 dim 0 : vector<32x128xf32>, i32 -> vector<32x128xf32>
    %204 = arith.select %36, %182, %203 : vector<32x128xi1>, vector<32x128xf32>
    %c31_i32_60 = arith.constant 31 : i32
    %205 = tpu.dynamic_rotate %182 by %c31_i32_60 dim 0 : vector<32x128xf32>, i32 -> vector<32x128xf32>
    %206 = arith.select %38, %182, %205 : vector<32x128xi1>, vector<32x128xf32>
    %207 = arith.minimumf %204, %206 : vector<32x128xf32>
    %208 = arith.minimumf %207, %182 : vector<32x128xf32>
    %c1_i32_61 = arith.constant 1 : i32
    %209 = tpu.dynamic_rotate %182 by %c1_i32_61 dim 1 : vector<32x128xf32>, i32 -> vector<32x128xf32>
    %210 = arith.select %40, %182, %209 : vector<32x128xi1>, vector<32x128xf32>
    %c127_i32_62 = arith.constant 127 : i32
    %211 = tpu.dynamic_rotate %182 by %c127_i32_62 dim 1 : vector<32x128xf32>, i32 -> vector<32x128xf32>
    %212 = arith.select %42, %182, %211 : vector<32x128xi1>, vector<32x128xf32>
    %213 = arith.minimumf %210, %212 : vector<32x128xf32>
    %214 = arith.minimumf %213, %182 : vector<32x128xf32>
    %215 = arith.minimumf %208, %214 : vector<32x128xf32>
    %c1_i32_63 = arith.constant 1 : i32
    %216 = tpu.dynamic_rotate %215 by %c1_i32_63 dim 0 : vector<32x128xf32>, i32 -> vector<32x128xf32>
    %217 = arith.select %36, %215, %216 : vector<32x128xi1>, vector<32x128xf32>
    %c31_i32_64 = arith.constant 31 : i32
    %218 = tpu.dynamic_rotate %215 by %c31_i32_64 dim 0 : vector<32x128xf32>, i32 -> vector<32x128xf32>
    %219 = arith.select %38, %215, %218 : vector<32x128xi1>, vector<32x128xf32>
    %220 = arith.maximumf %217, %219 : vector<32x128xf32>
    %221 = arith.maximumf %220, %215 : vector<32x128xf32>
    %c1_i32_65 = arith.constant 1 : i32
    %222 = tpu.dynamic_rotate %221 by %c1_i32_65 dim 1 : vector<32x128xf32>, i32 -> vector<32x128xf32>
    %223 = arith.select %40, %221, %222 : vector<32x128xi1>, vector<32x128xf32>
    %c127_i32_66 = arith.constant 127 : i32
    %224 = tpu.dynamic_rotate %221 by %c127_i32_66 dim 1 : vector<32x128xf32>, i32 -> vector<32x128xf32>
    %225 = arith.select %42, %221, %224 : vector<32x128xi1>, vector<32x128xf32>
    %226 = arith.maximumf %223, %225 : vector<32x128xf32>
    %227 = arith.maximumf %226, %221 : vector<32x128xf32>
    %228 = arith.subf %182, %227 : vector<32x128xf32>
    %cst_67 = arith.constant 0.000000e+00 : f32
    %229 = vector.broadcast %cst_67 : f32 to vector<32x128xf32>
    %230 = arith.maximumf %228, %229 : vector<32x128xf32>
    %231 = arith.mulf %202, %230 : vector<32x128xf32>
    %232 = arith.subf %230, %231 : vector<32x128xf32>
    %cst_68 = arith.constant 0.000000e+00 : f32
    %233 = vector.broadcast %cst_68 : f32 to vector<32x128xf32>
    %234 = arith.maximumf %232, %233 : vector<32x128xf32>
    %235 = arith.addf %202, %234 : vector<32x128xf32>
    %236 = vector.extract_strided_slice %235 {offsets = [0, 0], sizes = [16, 128], strides = [1, 1]} : vector<32x128xf32> to vector<16x128xf32>
    %237 = vector.extract_strided_slice %235 {offsets = [16, 0], sizes = [16, 128], strides = [1, 1]} : vector<32x128xf32> to vector<16x128xf32>
    %c0_69 = arith.constant 0 : index
    %c0_70 = arith.constant 0 : index
    %238 = vector.load %arg1[%c0_69, %c0_70] : memref<32x128xf32, #tpu.memory_space<vmem>>, vector<16x128xf32>
    %c16 = arith.constant 16 : index
    %c0_71 = arith.constant 0 : index
    %239 = vector.load %arg1[%c16, %c0_71] : memref<32x128xf32, #tpu.memory_space<vmem>>, vector<16x128xf32>
    %240 = arith.mulf %236, %239 : vector<16x128xf32>
    %241 = vector.extract_strided_slice %240 {offsets = [0, 0], sizes = [8, 128], strides = [1, 1]} : vector<16x128xf32> to vector<8x128xf32>
    %242 = vector.extract_strided_slice %240 {offsets = [8, 0], sizes = [8, 128], strides = [1, 1]} : vector<16x128xf32> to vector<8x128xf32>
    %243 = arith.addf %241, %242 : vector<8x128xf32>
    %244 = vector.extract_strided_slice %236 {offsets = [0, 0], sizes = [8, 128], strides = [1, 1]} : vector<16x128xf32> to vector<8x128xf32>
    %245 = vector.extract_strided_slice %236 {offsets = [8, 0], sizes = [8, 128], strides = [1, 1]} : vector<16x128xf32> to vector<8x128xf32>
    %246 = arith.addf %244, %245 : vector<8x128xf32>
    %247 = arith.mulf %237, %238 : vector<16x128xf32>
    %248 = vector.extract_strided_slice %247 {offsets = [0, 0], sizes = [8, 128], strides = [1, 1]} : vector<16x128xf32> to vector<8x128xf32>
    %249 = vector.extract_strided_slice %247 {offsets = [8, 0], sizes = [8, 128], strides = [1, 1]} : vector<16x128xf32> to vector<8x128xf32>
    %250 = arith.addf %248, %249 : vector<8x128xf32>
    %251 = vector.extract_strided_slice %237 {offsets = [0, 0], sizes = [8, 128], strides = [1, 1]} : vector<16x128xf32> to vector<8x128xf32>
    %252 = vector.extract_strided_slice %237 {offsets = [8, 0], sizes = [8, 128], strides = [1, 1]} : vector<16x128xf32> to vector<8x128xf32>
    %253 = arith.addf %251, %252 : vector<8x128xf32>
    %254 = tpu.concatenate %243, %246, %250, %253 in 0 : vector<8x128xf32>, vector<8x128xf32>, vector<8x128xf32>, vector<8x128xf32> -> vector<32x128xf32>
    %c0_72 = arith.constant 0 : index
    %c0_73 = arith.constant 0 : index
    %255 = vector.load %arg2[%c0_72, %c0_73] : memref<32x128xf32, #tpu.memory_space<vmem>>, vector<32x128xf32>
    tpu.vector_store %arg2[%c0_72, %c0_73], %254 {strides = array<i32>} : memref<32x128xf32, #tpu.memory_space<vmem>>, vector<32x128xf32>,
    return
  }
  func.func @transform_0(%arg0: i32) -> (i32, i32) {
    %c0_i32 = arith.constant 0 : i32
    %c0_i32_0 = arith.constant 0 : i32
    return %arg0, %c0_i32 : i32, i32
  }
  func.func @transform_1(%arg0: i32) -> (i32, i32) {
    %c0_i32 = arith.constant 0 : i32
    %c0_i32_0 = arith.constant 0 : i32
    return %arg0, %c0_i32 : i32, i32
  }
}

</mosaic_0001>

<bundles_post_ra>
// kernel: tpu_custom_call.1
= control target key start
LH: loop header
LB: loop body
LE: loop exit
PB: predicated region body
PF: predicated region fallthrough
CT: control target
= control target key end

     0   :  { %6 = vsyncpa [#allocation3], 0  ;;  %s2262_s0 = inlined_call_operand.hbm [shape: f32[32,128], index: 0, kind: input, shape index: {}]   ;;  %s2263_s1 = inlined_call_operand.hbm [shape: f32[32,128], index: 1, kind: output, shape index: {}]  }
   0x1   :  { %7 = vsyncpa [#allocation4], 0  ;;  %s995_s6 = smov [#allocation2]   ;;  %s947_s10 = scalar_lea.hbm %s2262_s0, 512 }
   0x2   :  { %s13_s7 = sshll.u32 %s995_s6, 4  ;;  %p948_p0 = scmp.ne.s32.totalorder %s2262_s0, %s947_s10  ;;  %s14_s7 = int_to_ptr.vmem [resolvable:$true] %s13_s7 }
   0x3   :  { %p951_p1 = scmp.lt.u32.totalorder %s947_s10, %s2262_s0 }
   0x5   :  { %p953_p2 = pnand %p951_p1, %p948_p0 }
   0x7   :  { %956 = shalt.err (!%p953_p2)
}
   0x8   :  { %s957_s15 = scalar_lea.vmem %s14_s7, 512  ;;  %p962_p4 = scmp.lt.s32.totalorder %s14_s7, %s14_s7 }
   0x9   :  { %p958_p3 = scmp.ne.s32.totalorder %s14_s7, %s957_s15  ;;  %p963_p5 = scmp.lt.s32.totalorder %s957_s15, %s957_s15 }
   0xb   :  { %p964_p6 = por %p963_p5, %p962_p4 }
   0xd   :  { %p965_p7 = pnand %p964_p6, %p958_p3 }
   0xf   :  { %968 = shalt.err (!%p965_p7)
}
  0x10   :  { %s996_s16 = smov 128   ;;  %s997_s17 = smov 8  }
  0x11   :  { %19 = dma.hbm_to_vmem [thread:$0]  %s2262_s0, 512, %s14_s7, [#allocation3], %s996_s16, %s996_s16, %s997_s17  }
  0x12   :  { %991 = dma.done.wait [#allocation3], 512  }
  0x13   :  { %992 = vsyncadd [#allocation3], 4294966784  ;;  %v1026_v0 = vld [vmem:[#allocation2 + $0x10] sm:$0xff]  ;;  %v1028_v1 = vld [vmem:[#allocation2] sm:$0xff]  ;;  %s998_s20 = smov 1   ;;  %s999_s0 = smov 127   ;;  %v27_v4 = vlaneseq }
  0x14   :  { %142 = vrot.lane.b32.xlu1 %v1026_v0, %s998_s20  ;;  %138 = vrot.lane.b32.xlu0 %v1028_v1, %s998_s20  ;;  %v1034_v2 = vld [vmem:[#allocation2 + $0x18] sm:$0xff]  ;;  %v1036_v3 = vld [vmem:[#allocation2 + $0x8] sm:$0xff]  ;;  %v119_v11 = vrot.slane %v1026_v0, 1  ;;  %v104_v12 = vrot.slane %v1028_v1, 7  ;;  %v106_v17 = vrot.slane %v1026_v0, 7  ;;  %v117_v21 = vrot.slane %v1028_v1, 1 }
  0x15   :  { %v1050_v5 = vshrl.u32 %v27_v4, 7  ;;  %v118_v13 = vrot.slane %v1036_v3, 1  ;;  %v107_v14 = vrot.slane %v1034_v2, 7  ;;  %v33_v15 = vand.u32 127, %v27_v4  ;;  %s1000_s21 = smov [#allocation5]  }
  0x16   :  { %v120_v18 = vrot.slane %v1034_v2, 1  ;;  %v105_v20 = vrot.slane %v1036_v3, 7  ;;  %v2288_v24 = vmov 0  ;;  %v2291_v26 = vmov 0  ;;  %s925_s22 = sshll.u32 %s1000_s21, 4  ;;  %s926_s22 = int_to_ptr.vmem [resolvable:$true] %s925_s22 }
  0x17   :  { %v29_v6 = vadd.s32 8, %v1050_v5  ;;  %v31_v7 = vadd.s32 24, %v1050_v5  ;;  %v30_v8 = vadd.s32 16, %v1050_v5  ;;  %v38_v10 = vand.u32 15, %v1050_v5  ;;  %s969_s23 = scalar_lea.vmem %s926_s22, 512  ;;  %p974_p9 = scmp.lt.s32.totalorder %s926_s22, %s926_s22 }
  0x18   :  { %144 = vrot.lane.b32.xlu1 %v1034_v2, %s998_s20  ;;  %140 = vrot.lane.b32.xlu0 %v1036_v3, %s998_s20  ;;  %vm108_vm0 = vcmp.lt.s32.totalorder %v1050_v5, 1  ;;  %vm121_vm1 = vcmp.lt.s32.totalorder %v1050_v5, 7  ;;  %v86_v28 = vand.u32 15, %v33_v15  ;;  %p970_p8 = scmp.ne.s32.totalorder %s926_s22, %s969_s23  ;;  %p975_p10 = scmp.lt.s32.totalorder %s969_s23, %s969_s23 }
  0x19   :  { %v45_v9 = vand.u32 15, %v29_v6  ;;  %v59_v16 = vand.u32 15, %v31_v7  ;;  %v52_v19 = vand.u32 15, %v30_v8  ;;  %v123_v25 = vsel %vm121_vm1, %v118_v13, %v119_v11 }
  0x1a   :  { %vm1072_vm3 = vcmp.eq.s32.totalorder %v38_v10, 0  ;;  %v112_v27 = vsel %vm108_vm0, %v107_v14, %v104_v12  ;;  %v125_v30 = vsel %vm121_vm1, %v120_v18, %v117_v21  ;;  %v110_v32 = vsel %vm108_vm0, %v105_v20, %v106_v17  ;;  %p976_p11 = por %p975_p10, %p974_p9 }
  0x1b   :  { %vm1066_vm2 = vcmp.eq.s32.totalorder %v45_v9, 15  ;;  %v2292_v26 = vsel %vm1072_vm3, 4294967295, %v2291_v26  ;;  %vm1078_vm4 = vcmp.eq.s32.totalorder %v59_v16, 15  ;;  %vm1084_vm5 = vcmp.eq.s32.totalorder %v52_v19, 0 }
  0x1c   :  { %152 = vrot.lane.b32.xlu1 %v1036_v3, %s999_s0  ;;  %150 = vrot.lane.b32.xlu0 %v1028_v1, %s999_s0  ;;  %v2289_v24 = vsel %vm1066_vm2, 4294967295, %v2288_v24  ;;  %2293 = vst [vmem:[#allocation9_spill] sm:$0xff] %v2292_v26  ;;  %v111_v33 = vsel %vm108_vm0, %v104_v12, %v105_v20  ;;  %v127_v34 = vsel %vm1066_vm2, %v1036_v3, %v123_v25  ;;  %vm1110_vm6 = vcmp.eq.s32.totalorder %v86_v28, 0  ;;  %p977_p12 = pnand %p976_p11, %p970_p8 }
  0x1d   :  { %2290 = vst [vmem:[#allocation8_spill] sm:$0xff] %v2289_v24  ;;  %v113_v35 = vsel %vm1072_vm3, %v1028_v1, %v112_v27  ;;  %v124_v36 = vsel %vm121_vm1, %v117_v21, %v118_v13  ;;  %v109_v39 = vsel %vm108_vm0, %v106_v17, %v107_v14  ;;  %v129_v40 = vsel %vm1078_vm4, %v1034_v2, %v125_v30 }
  0x1e   :  { %v115_v41 = vsel %vm1084_vm5, %v1026_v0, %v110_v32  ;;  %v122_v42 = vsel %vm121_vm1, %v119_v11, %v120_v18  ;;  %vm1114_vm7 = vcmp.eq.s32.totalorder %v86_v28, 15  ;;  %v131_v45 = vmin.f32 %v111_v33, %v127_v34 }
  0x1f   :  { %v130_v46 = vmin.f32 %v113_v35, %v124_v36  ;;  %v133_v49 = vmin.f32 %v109_v39, %v129_v40  ;;  %v132_v50 = vmin.f32 %v115_v41, %v122_v42 }
  0x20   :  { %156 = vrot.lane.b32.xlu1 %v1034_v2, %s999_s0  ;;  %154 = vrot.lane.b32.xlu0 %v1026_v0, %s999_s0  ;;  %v135_v55 = vmin.f32 %v131_v45, %v1036_v3 }
  0x21   :  { %v134_v57 = vmin.f32 %v130_v46, %v1028_v1  ;;  %v137_v62 = vmin.f32 %v133_v49, %v1034_v2  ;;  %v136_v63 = vmin.f32 %v132_v50, %v1026_v0 }
  0x86   :  { %v143_v22 = vpop.permute.xlu1 %142  ;;  %v139_v23 = vpop.permute.xlu0 %138 }
  0x87   :  { %v146_v51 = vsel %vm1110_vm6, %v1028_v1, %v139_v23  ;;  %v148_v6 = vsel %vm1110_vm6, %v1026_v0, %v143_v22 }
  0x8a   :  { %v145_v37 = vpop.permute.xlu1 %144  ;;  %v141_v38 = vpop.permute.xlu0 %140 }
  0x8b   :  { %v147_v52 = vsel %vm1110_vm6, %v1036_v3, %v141_v38  ;;  %v149_v7 = vsel %vm1110_vm6, %v1034_v2, %v145_v37 }
  0x8e   :  { %v153_v47 = vpop.permute.xlu1 %152  ;;  %v151_v48 = vpop.permute.xlu0 %150 }
  0x8f   :  { %v159_v53 = vsel %vm1114_vm7, %v1036_v3, %v153_v47  ;;  %v158_v54 = vsel %vm1114_vm7, %v1028_v1, %v151_v48 }
  0x90   :  { %v163_v56 = vmin.f32 %v147_v52, %v159_v53  ;;  %v162_v58 = vmin.f32 %v146_v51, %v158_v54 }
  0x92   :  { %v167_v59 = vmin.f32 %v163_v56, %v1036_v3  ;;  %v166_v60 = vmin.f32 %v162_v58, %v1028_v1  ;;  %v157_v61 = vpop.permute.xlu1 %156  ;;  %v155_v4 = vpop.permute.xlu0 %154 }
  0x93   :  { %v161_v3 = vsel %vm1114_vm7, %v1034_v2, %v157_v61  ;;  %v160_v1 = vsel %vm1114_vm7, %v1026_v0, %v155_v4 }
  0x94   :  { %v1148_v8 = vmin.f32 %v135_v55, %v167_v59  ;;  %v1150_v9 = vmin.f32 %v134_v57, %v166_v60  ;;  %v165_v10 = vmin.f32 %v149_v7, %v161_v3  ;;  %v164_v11 = vmin.f32 %v148_v6, %v160_v1 }
  0x96   :  { %2302 = vst [vmem:[#allocation10_spill] sm:$0xff] %v1148_v8  ;;  %2303 = vst [vmem:[#allocation11_spill] sm:$0xff] %v1150_v9  ;;  %v169_v12 = vmin.f32 %v165_v10, %v1034_v2  ;;  %v168_v13 = vmin.f32 %v164_v11, %v1026_v0  ;;  %254 = vrot.lane.b32.xlu0 %v1150_v9, %s998_s20  ;;  %256 = vrot.lane.b32.xlu1 %v1148_v8, %s998_s20  ;;  %v186_v14 = vrot.slane %v1150_v9, 1 }
  0x97   :  { %v187_v15 = vrot.slane %v1148_v8, 1  ;;  %v174_v18 = vrot.slane %v1150_v9, 7  ;;  %v175_v2 = vrot.slane %v1148_v8, 7 }
  0x98   :  { %v1160_v16 = vmin.f32 %v137_v62, %v169_v12  ;;  %v1162_v17 = vmin.f32 %v136_v63, %v168_v13 }
  0x99   :  { %v1176_v22 = vsel %vm121_vm1, %v186_v14, %v187_v15  ;;  %v1195_v32 = vsel %vm108_vm0, %v174_v18, %v175_v2 }
  0x9a   :  { %2304 = vst [vmem:[#allocation12_spill] sm:$0xff] %v1160_v16  ;;  %2305 = vst [vmem:[#allocation13_spill] sm:$0xff] %v1162_v17  ;;  %258 = vrot.lane.b32.xlu0 %v1162_v17, %s998_s20  ;;  %260 = vrot.lane.b32.xlu1 %v1160_v16, %s998_s20  ;;  %v177_v0 = vrot.slane %v1160_v16, 7  ;;  %v188_v19 = vrot.slane %v1162_v17, 1  ;;  %v176_v20 = vrot.slane %v1162_v17, 7  ;;  %v189_v21 = vrot.slane %v1160_v16, 1 }
  0x9c   :  { %v181_v23 = vsel %vm108_vm0, %v177_v0, %v174_v18  ;;  %v191_v25 = vsel %vm121_vm1, %v187_v15, %v188_v19  ;;  %v1184_v27 = vsel %vm121_vm1, %v188_v19, %v189_v21  ;;  %v179_v28 = vsel %vm108_vm0, %v175_v2, %v176_v20 }
  0x9d   :  { %v1191_v30 = vsel %vm1072_vm3, %v1150_v9, %v181_v23  ;;  %v1200_v33 = vsel %vm1066_vm2, %v1148_v8, %v191_v25  ;;  %v1205_v34 = vsel %vm1084_vm5, %v1162_v17, %v179_v28  ;;  %v1217_v37 = vsel %vm108_vm0, %v176_v20, %v177_v0 }
  0x9e   :  { %266 = vrot.lane.b32.xlu0 %v1150_v9, %s999_s0  ;;  %268 = vrot.lane.b32.xlu1 %v1148_v8, %s999_s0  ;;  %v198_v35 = vmax.f32 %v1191_v30, %v1176_v22  ;;  %v193_v39 = vsel %vm121_vm1, %v189_v21, %v186_v14  ;;  %v246_v48 = vmin.f32 %v1191_v30, %v1176_v22 }
  0x9f   :  { %v1226_v40 = vsel %vm1078_vm4, %v1160_v16, %v193_v39  ;;  %v247_v51 = vmin.f32 %v1195_v32, %v1200_v33  ;;  %v248_v59 = vmin.f32 %v1205_v34, %v1184_v27  ;;  %v2315_v22 = vmax.f32 %v1205_v34, %v1184_v27 }
  0xa0   :  { %v250_v58 = vmin.f32 %v246_v48, %v1150_v9  ;;  %v249_v4 = vmin.f32 %v1217_v37, %v1226_v40 }
  0xa1   :  { %v251_v61 = vmin.f32 %v247_v51, %v1148_v8  ;;  %v252_v15 = vmin.f32 %v248_v59, %v1162_v17  ;;  %v1572_v30 = vmax.f32 %v2315_v22, %v1162_v17 }
  0xa2   :  { %270 = vrot.lane.b32.xlu0 %v1162_v17, %s999_s0  ;;  %272 = vrot.lane.b32.xlu1 %v1160_v16, %s999_s0  ;;  %v253_v2 = vmin.f32 %v249_v4, %v1160_v16 }
 0x108   :  { %v255_v42 = vpop.permute.xlu0 %254  ;;  %v257_v45 = vpop.permute.xlu1 %256 }
 0x109   :  { %v262_v52 = vsel %vm1110_vm6, %v1150_v9, %v255_v42  ;;  %v263_v53 = vsel %vm1110_vm6, %v1148_v8, %v257_v45 }
 0x10c   :  { %v259_v46 = vpop.permute.xlu0 %258  ;;  %v261_v47 = vpop.permute.xlu1 %260 }
 0x10d   :  { %v264_v7 = vsel %vm1110_vm6, %v1162_v17, %v259_v46  ;;  %v265_v3 = vsel %vm1110_vm6, %v1160_v16, %v261_v47 }
 0x110   :  { %v267_v49 = vpop.permute.xlu0 %266  ;;  %v269_v50 = vpop.permute.xlu1 %268 }
 0x111   :  { %v274_v54 = vsel %vm1114_vm7, %v1150_v9, %v267_v49  ;;  %v275_v55 = vsel %vm1114_vm7, %v1148_v8, %v269_v50 }
 0x112   :  { %v278_v56 = vmin.f32 %v262_v52, %v274_v54  ;;  %v279_v57 = vmin.f32 %v263_v53, %v275_v55 }
 0x114   :  { %v282_v60 = vmin.f32 %v278_v56, %v1150_v9  ;;  %v283_v62 = vmin.f32 %v279_v57, %v1148_v8  ;;  %v271_v63 = vpop.permute.xlu0 %270  ;;  %v273_v6 = vpop.permute.xlu1 %272 }
 0x115   :  { %v276_v1 = vsel %vm1114_vm7, %v1162_v17, %v271_v63  ;;  %v277_v10 = vsel %vm1114_vm7, %v1160_v16, %v273_v6 }
 0x116   :  { %v1270_v11 = vmin.f32 %v250_v58, %v282_v60  ;;  %v1272_v12 = vmin.f32 %v251_v61, %v283_v62  ;;  %v280_v13 = vmin.f32 %v264_v7, %v276_v1  ;;  %v281_v14 = vmin.f32 %v265_v3, %v277_v10 }
 0x118   :  { %2306 = vst [vmem:[#allocation14_spill] sm:$0xff] %v1270_v11  ;;  %2307 = vst [vmem:[#allocation15_spill] sm:$0xff] %v1272_v12  ;;  %v284_v18 = vmin.f32 %v280_v13, %v1162_v17  ;;  %v285_v0 = vmin.f32 %v281_v14, %v1160_v16  ;;  %386 = vrot.lane.b32.xlu0 %v1270_v11, %s998_s20  ;;  %388 = vrot.lane.b32.xlu1 %v1272_v12, %s998_s20  ;;  %v290_v19 = vrot.slane %v1270_v11, 7 }
 0x119   :  { %v291_v20 = vrot.slane %v1272_v12, 7  ;;  %v303_v21 = vrot.slane %v1272_v12, 1  ;;  %v302_v23 = vrot.slane %v1270_v11, 1 }
 0x11a   :  { %v1286_v25 = vmin.f32 %v252_v15, %v284_v18  ;;  %v1288_v28 = vmin.f32 %v253_v2, %v285_v0 }
 0x11b   :  { %v1300_v47 = vsel %vm108_vm0, %v290_v19, %v291_v20  ;;  %v1304_v48 = vsel %vm121_vm1, %v302_v23, %v303_v21 }
 0x11c   :  { %392 = vrot.lane.b32.xlu1 %v1288_v28, %s998_s20  ;;  %390 = vrot.lane.b32.xlu0 %v1286_v25, %s998_s20  ;;  %v304_v39 = vrot.slane %v1286_v25, 1  ;;  %v293_v42 = vrot.slane %v1288_v28, 7  ;;  %v305_v45 = vrot.slane %v1288_v28, 1  ;;  %v292_v46 = vrot.slane %v1286_v25, 7 }
 0x11e   :  { %v307_v49 = vsel %vm121_vm1, %v303_v21, %v304_v39  ;;  %v297_v50 = vsel %vm108_vm0, %v293_v42, %v290_v19  ;;  %v309_v51 = vsel %vm121_vm1, %v305_v45, %v302_v23  ;;  %v1314_v52 = vsel %vm108_vm0, %v292_v46, %v293_v42 }
 0x11f   :  { %v1319_v53 = vsel %vm1066_vm2, %v1272_v12, %v307_v49  ;;  %v1324_v54 = vsel %vm1072_vm3, %v1270_v11, %v297_v50  ;;  %v1329_v55 = vsel %vm1078_vm4, %v1288_v28, %v309_v51  ;;  %v295_v56 = vsel %vm108_vm0, %v291_v20, %v292_v46 }
 0x120   :  { %400 = vrot.lane.b32.xlu1 %v1272_v12, %s999_s0  ;;  %398 = vrot.lane.b32.xlu0 %v1270_v11, %s999_s0  ;;  %v1346_v60 = vsel %vm1084_vm5, %v1286_v25, %v295_v56  ;;  %v1350_v61 = vsel %vm121_vm1, %v304_v39, %v305_v45  ;;  %v379_v3 = vmin.f32 %v1300_v47, %v1319_v53 }
 0x121   :  { %v378_v10 = vmin.f32 %v1324_v54, %v1304_v48  ;;  %v381_v21 = vmin.f32 %v1314_v52, %v1329_v55  ;;  %v380_v49 = vmin.f32 %v1346_v60, %v1350_v61  ;;  %v2316_v27 = vmax.f32 %v1300_v47, %v1319_v53 }
 0x122   :  { %v383_v20 = vmin.f32 %v379_v3, %v1272_v12 }
 0x123   :  { %v382_v39 = vmin.f32 %v378_v10, %v1270_v11 }
 0x124   :  { %404 = vrot.lane.b32.xlu1 %v1288_v28, %s999_s0  ;;  %402 = vrot.lane.b32.xlu0 %v1286_v25, %s999_s0 }
 0x18a   :  { %v387_v63 = vpop.permute.xlu0 %386  ;;  %v389_v4 = vpop.permute.xlu1 %388 }
 0x18b   :  { %v394_v14 = vsel %vm1110_vm6, %v1270_v11, %v387_v63  ;;  %v395_v15 = vsel %vm1110_vm6, %v1272_v12, %v389_v4 }
 0x18e   :  { %v393_v6 = vpop.permute.xlu1 %392  ;;  %v391_v7 = vpop.permute.xlu0 %390 }
 0x18f   :  { %v397_v50 = vsel %vm1110_vm6, %v1288_v28, %v393_v6  ;;  %v396_v51 = vsel %vm1110_vm6, %v1286_v25, %v391_v7  ;;  %v385_v6 = vmin.f32 %v381_v21, %v1288_v28  ;;  %v384_v7 = vmin.f32 %v380_v49, %v1286_v25 }
 0x192   :  { %v401_v1 = vpop.permute.xlu1 %400  ;;  %v399_v13 = vpop.permute.xlu0 %398 }
 0x193   :  { %v407_v18 = vsel %vm1114_vm7, %v1272_v12, %v401_v1  ;;  %v406_v2 = vsel %vm1114_vm7, %v1270_v11, %v399_v13 }
 0x194   :  { %v411_v0 = vmin.f32 %v395_v15, %v407_v18  ;;  %v410_v19 = vmin.f32 %v394_v14, %v406_v2 }
 0x196   :  { %v415_v23 = vmin.f32 %v411_v0, %v1272_v12  ;;  %v414_v42 = vmin.f32 %v410_v19, %v1270_v11  ;;  %v405_v45 = vpop.permute.xlu1 %404  ;;  %v403_v46 = vpop.permute.xlu0 %402 }
 0x197   :  { %v409_v56 = vsel %vm1114_vm7, %v1288_v28, %v405_v45  ;;  %v408_v63 = vsel %vm1114_vm7, %v1286_v25, %v403_v46 }
 0x198   :  { %v1394_v4 = vmin.f32 %v383_v20, %v415_v23  ;;  %v1396_v3 = vmin.f32 %v382_v39, %v414_v42  ;;  %v413_v1 = vmin.f32 %v397_v50, %v409_v56  ;;  %v412_v10 = vmin.f32 %v396_v51, %v408_v63 }
 0x19a   :  { %v417_v13 = vmin.f32 %v413_v1, %v1288_v28  ;;  %v416_v14 = vmin.f32 %v412_v10, %v1286_v25  ;;  %518 = vrot.lane.b32.xlu0 %v1396_v3, %s998_s20  ;;  %520 = vrot.lane.b32.xlu1 %v1394_v4, %s998_s20  ;;  %v434_v15 = vrot.slane %v1396_v3, 1  ;;  %v435_v18 = vrot.slane %v1394_v4, 1 }
 0x19b   :  { %v422_v19 = vrot.slane %v1396_v3, 7  ;;  %v423_v20 = vrot.slane %v1394_v4, 7 }
 0x19c   :  { %v1408_v2 = vmin.f32 %v385_v6, %v417_v13  ;;  %v1410_v0 = vmin.f32 %v384_v7, %v416_v14  ;;  %v1424_v45 = vsel %vm121_vm1, %v434_v15, %v435_v18 }
 0x19d   :  { %v1443_v63 = vsel %vm108_vm0, %v422_v19, %v423_v20 }
 0x19e   :  { %522 = vrot.lane.b32.xlu0 %v1410_v0, %s998_s20  ;;  %524 = vrot.lane.b32.xlu1 %v1408_v2, %s998_s20  ;;  %v425_v21 = vrot.slane %v1408_v2, 7  ;;  %v436_v23 = vrot.slane %v1410_v0, 1  ;;  %v424_v39 = vrot.slane %v1410_v0, 7  ;;  %v437_v42 = vrot.slane %v1408_v2, 1 }
 0x1a0   :  { %v429_v46 = vsel %vm108_vm0, %v425_v21, %v422_v19  ;;  %v439_v49 = vsel %vm121_vm1, %v435_v18, %v436_v23  ;;  %v427_v50 = vsel %vm108_vm0, %v423_v20, %v424_v39  ;;  %v1434_v51 = vsel %vm121_vm1, %v436_v23, %v437_v42 }
 0x1a1   :  { %v1439_v56 = vsel %vm1072_vm3, %v1396_v3, %v429_v46  ;;  %v1448_v1 = vsel %vm1066_vm2, %v1394_v4, %v439_v49  ;;  %v1453_v10 = vsel %vm1084_vm5, %v1410_v0, %v427_v50  ;;  %v1465_v7 = vsel %vm108_vm0, %v424_v39, %v425_v21 }
 0x1a2   :  { %530 = vrot.lane.b32.xlu0 %v1396_v3, %s999_s0  ;;  %532 = vrot.lane.b32.xlu1 %v1394_v4, %s999_s0  ;;  %v441_v18 = vsel %vm121_vm1, %v437_v42, %v434_v15  ;;  %v510_v15 = vmin.f32 %v1439_v56, %v1424_v45  ;;  %v511_v49 = vmin.f32 %v1443_v63, %v1448_v1 }
 0x1a3   :  { %v1474_v19 = vsel %vm1078_vm4, %v1408_v2, %v441_v18  ;;  %v512_v58 = vmin.f32 %v1453_v10, %v1434_v51 }
 0x1a4   :  { %v514_v59 = vmin.f32 %v510_v15, %v1396_v3  ;;  %v515_v57 = vmin.f32 %v511_v49, %v1394_v4 }
 0x1a6   :  { %534 = vrot.lane.b32.xlu0 %v1410_v0, %s999_s0  ;;  %536 = vrot.lane.b32.xlu1 %v1408_v2, %s999_s0 }
 0x20c   :  { %v519_v21 = vpop.permute.xlu0 %518  ;;  %v521_v23 = vpop.permute.xlu1 %520 }
 0x20d   :  { %v526_v18 = vsel %vm1110_vm6, %v1396_v3, %v519_v21  ;;  %v527_v14 = vsel %vm1110_vm6, %v1394_v4, %v521_v23 }
 0x210   :  { %v523_v39 = vpop.permute.xlu0 %522  ;;  %v525_v46 = vpop.permute.xlu1 %524 }
 0x214   :  { %v531_v42 = vpop.permute.xlu0 %530  ;;  %v533_v50 = vpop.permute.xlu1 %532 }
 0x215   :  { %v538_v20 = vsel %vm1114_vm7, %v1396_v3, %v531_v42  ;;  %v539_v6 = vsel %vm1114_vm7, %v1394_v4, %v533_v50  ;;  %v513_v42 = vmin.f32 %v1465_v7, %v1474_v19 }
 0x216   :  { %v542_v13 = vmin.f32 %v526_v18, %v538_v20  ;;  %v543_v62 = vmin.f32 %v527_v14, %v539_v6  ;;  %v528_v6 = vsel %vm1110_vm6, %v1410_v0, %v523_v39  ;;  %v529_v14 = vsel %vm1110_vm6, %v1408_v2, %v525_v46 }
 0x217   :  { %v516_v39 = vmin.f32 %v512_v58, %v1410_v0  ;;  %v517_v46 = vmin.f32 %v513_v42, %v1408_v2 }
 0x218   :  { %v546_v21 = vmin.f32 %v542_v13, %v1396_v3  ;;  %v547_v23 = vmin.f32 %v543_v62, %v1394_v4  ;;  %v535_v38 = vpop.permute.xlu0 %534  ;;  %v537_v41 = vpop.permute.xlu1 %536 }
 0x219   :  { %v540_v13 = vsel %vm1114_vm7, %v1410_v0, %v535_v38  ;;  %v541_v62 = vsel %vm1114_vm7, %v1408_v2, %v537_v41 }
 0x21a   :  { %v1518_v20 = vmin.f32 %v514_v59, %v546_v21  ;;  %v1520_v15 = vmin.f32 %v515_v57, %v547_v23  ;;  %v544_v49 = vmin.f32 %v528_v6, %v540_v13  ;;  %v545_v50 = vmin.f32 %v529_v14, %v541_v62 }
 0x21b   :  { %v2313_v57 = vmax.f32 %v1195_v32, %v1200_v33  ;;  %v2314_v59 = vmax.f32 %v1217_v37, %v1226_v40  ;;  %v1590_v32 = vmax.f32 %v2316_v27, %v1272_v12  ;;  %v2317_v33 = vmax.f32 %v1324_v54, %v1304_v48 }
 0x21c   :  { %2308 = vst [vmem:[#allocation16_spill] sm:$0xff] %v1518_v20  ;;  %2309 = vst [vmem:[#allocation17_spill] sm:$0xff] %v1520_v15  ;;  %v548_v18 = vmin.f32 %v544_v49, %v1410_v0  ;;  %v549_v36 = vmin.f32 %v545_v50, %v1408_v2  ;;  %652 = vrot.lane.b32.xlu1 %v1520_v15, %s998_s20  ;;  %650 = vrot.lane.b32.xlu0 %v1518_v20, %s998_s20  ;;  %v554_v40 = vrot.slane %v1518_v20, 7 }
 0x21d   :  { %v1556_v58 = vmax.f32 %v2313_v57, %v1148_v8  ;;  %v1566_v21 = vmax.f32 %v2314_v59, %v1160_v16  ;;  %v1596_v34 = vmax.f32 %v2317_v33, %v1270_v11  ;;  %v567_v23 = vrot.slane %v1520_v15, 1 }
 0x21e   :  { %v1530_v38 = vmin.f32 %v516_v39, %v548_v18  ;;  %v1532_v41 = vmin.f32 %v517_v46, %v549_v36  ;;  %v1550_v36 = vmax.f32 %v198_v35, %v1150_v9  ;;  %v566_v6 = vrot.slane %v1518_v20, 1 }
 0x21f   :  { %v555_v13 = vrot.slane %v1520_v15, 7 }
 0x220   :  { %2310 = vst [vmem:[#allocation18_spill] sm:$0xff] %v1530_v38  ;;  %2311 = vst [vmem:[#allocation19_spill] sm:$0xff] %v1532_v41  ;;  %654 = vrot.lane.b32.xlu0 %v1530_v38, %s998_s20  ;;  %656 = vrot.lane.b32.xlu1 %v1532_v41, %s998_s20  ;;  %v557_v35 = vrot.slane %v1532_v41, 7  ;;  %v568_v37 = vrot.slane %v1530_v38, 1  ;;  %v556_v54 = vrot.slane %v1530_v38, 7  ;;  %v569_v42 = vrot.slane %v1532_v41, 1 }
 0x221   :  { %2312 = vst [vmem:[#allocation20_spill] sm:$0xff] %v1550_v36  ;;  %v1630_v57 = vsel %vm121_vm1, %v566_v6, %v567_v23  ;;  %v1636_v22 = vsel %vm108_vm0, %v554_v40, %v555_v13 }
 0x222   :  { %v561_v48 = vsel %vm108_vm0, %v557_v35, %v554_v40  ;;  %v571_v14 = vsel %vm121_vm1, %v567_v23, %v568_v37  ;;  %v559_v18 = vsel %vm108_vm0, %v555_v13, %v556_v54  ;;  %v573_v46 = vsel %vm121_vm1, %v569_v42, %v566_v6 }
 0x223   :  { %v1617_v50 = vsel %vm1072_vm3, %v1518_v20, %v561_v48  ;;  %v1622_v39 = vsel %vm1066_vm2, %v1520_v15, %v571_v14  ;;  %v1640_v27 = vsel %vm121_vm1, %v568_v37, %v569_v42  ;;  %v1647_v23 = vsel %vm1084_vm5, %v1530_v38, %v559_v18 }
 0x224   :  { %662 = vrot.lane.b32.xlu0 %v1518_v20, %s999_s0  ;;  %664 = vrot.lane.b32.xlu1 %v1520_v15, %s999_s0  ;;  %v642_v59 = vmin.f32 %v1617_v50, %v1630_v57  ;;  %v643_v48 = vmin.f32 %v1636_v22, %v1622_v39  ;;  %v1651_v6 = vsel %vm108_vm0, %v556_v54, %v557_v35 }
 0x225   :  { %2318 = vst [vmem:[#allocation21_spill] sm:$0xff] %v1651_v6  ;;  %v1656_v40 = vsel %vm1078_vm4, %v1532_v41, %v573_v46  ;;  %v644_v11 = vmin.f32 %v1647_v23, %v1640_v27 }
 0x226   :  { %v646_v46 = vmin.f32 %v642_v59, %v1518_v20  ;;  %v647_v12 = vmin.f32 %v643_v48, %v1520_v15 }
 0x228   :  { %666 = vrot.lane.b32.xlu0 %v1530_v38, %s999_s0  ;;  %668 = vrot.lane.b32.xlu1 %v1532_v41, %s999_s0 }
 0x22c   :  { %206 = vrot.lane.b32.xlu0 %v1550_v36, %s998_s20  ;;  %208 = vrot.lane.b32.xlu1 %v1556_v58, %s998_s20 }
 0x230   :  { %212 = vrot.lane.b32.xlu1 %v1566_v21, %s998_s20  ;;  %210 = vrot.lane.b32.xlu0 %v1572_v30, %s998_s20 }
 0x234   :  { %220 = vrot.lane.b32.xlu1 %v1556_v58, %s999_s0  ;;  %218 = vrot.lane.b32.xlu0 %v1550_v36, %s999_s0 }
 0x238   :  { %224 = vrot.lane.b32.xlu1 %v1566_v21, %s999_s0  ;;  %222 = vrot.lane.b32.xlu0 %v1572_v30, %s999_s0 }
 0x23c   :  { %324 = vrot.lane.b32.xlu1 %v1590_v32, %s998_s20  ;;  %322 = vrot.lane.b32.xlu0 %v1596_v34, %s998_s20 }
 0x28e   :  { %v653_v47 = vpop.permute.xlu1 %652  ;;  %v651_v53 = vpop.permute.xlu0 %650 }
 0x28f   :  { %v659_v37 = vsel %vm1110_vm6, %v1520_v15, %v653_v47  ;;  %v658_v42 = vsel %vm1110_vm6, %v1518_v20, %v651_v53 }
 0x292   :  { %v655_v62 = vpop.permute.xlu0 %654  ;;  %v657_v49 = vpop.permute.xlu1 %656 }
 0x293   :  { %v661_v59 = vsel %vm1110_vm6, %v1532_v41, %v657_v49 }
 0x296   :  { %v663_v33 = vpop.permute.xlu0 %662  ;;  %v665_v14 = vpop.permute.xlu1 %664 }
 0x297   :  { %v670_v13 = vsel %vm1114_vm7, %v1518_v20, %v663_v33  ;;  %v671_v35 = vsel %vm1114_vm7, %v1520_v15, %v665_v14  ;;  %v645_v33 = vmin.f32 %v1651_v6, %v1656_v40  ;;  %v660_v14 = vsel %vm1110_vm6, %v1530_v38, %v655_v62 }
 0x298   :  { %v674_v54 = vmin.f32 %v658_v42, %v670_v13  ;;  %v675_v18 = vmin.f32 %v659_v37, %v671_v35  ;;  %v648_v62 = vmin.f32 %v644_v11, %v1530_v38 }
 0x299   :  { %v649_v49 = vmin.f32 %v645_v33, %v1532_v41 }
 0x29a   :  { %v678_v47 = vmin.f32 %v674_v54, %v1518_v20  ;;  %v679_v53 = vmin.f32 %v675_v18, %v1520_v15  ;;  %v667_v16 = vpop.permute.xlu0 %666  ;;  %v669_v17 = vpop.permute.xlu1 %668 }
 0x29b   :  { %v672_v37 = vsel %vm1114_vm7, %v1530_v38, %v667_v16  ;;  %v673_v48 = vsel %vm1114_vm7, %v1532_v41, %v669_v17 }
 0x29c   :  { %v1690_v42 = vmin.f32 %v646_v46, %v678_v47  ;;  %v1692_v13 = vmin.f32 %v647_v12, %v679_v53  ;;  %v676_v35 = vmin.f32 %v660_v14, %v672_v37  ;;  %v677_v54 = vmin.f32 %v661_v59, %v673_v48 }
 0x29e   :  { %v680_v18 = vmin.f32 %v676_v35, %v1530_v38  ;;  %v681_v9 = vmin.f32 %v677_v54, %v1532_v41  ;;  %v207_v8 = vpop.permute.xlu0 %206  ;;  %784 = vrot.lane.b32.xlu1 %v1692_v13, %s998_s20  ;;  %v209_v16 = vpop.permute.xlu1 %208  ;;  %782 = vrot.lane.b32.xlu0 %v1690_v42, %s998_s20  ;;  %v686_v11 = vrot.slane %v1690_v42, 7  ;;  %v699_v46 = vrot.slane %v1692_v13, 1 }
 0x29f   :  { %v698_v47 = vrot.slane %v1690_v42, 1  ;;  %v687_v48 = vrot.slane %v1692_v13, 7 }
 0x2a0   :  { %v1702_v17 = vmin.f32 %v648_v62, %v680_v18  ;;  %v1704_v12 = vmin.f32 %v649_v49, %v681_v9  ;;  %v214_v18 = vsel %vm1110_vm6, %v1550_v36, %v207_v8  ;;  %v215_v49 = vsel %vm1110_vm6, %v1556_v58, %v209_v16 }
 0x2a1   :  { %v1767_v26 = vsel %vm108_vm0, %v686_v11, %v687_v48 }
 0x2a2   :  { %2319 = vst [vmem:[#allocation22_spill] sm:$0xff] %v1702_v17  ;;  %2320 = vst [vmem:[#allocation23_spill] sm:$0xff] %v1704_v12  ;;  %v213_v53 = vpop.permute.xlu1 %212  ;;  %788 = vrot.lane.b32.xlu1 %v1704_v12, %s998_s20  ;;  %786 = vrot.lane.b32.xlu0 %v1702_v17, %s998_s20  ;;  %v211_v33 = vpop.permute.xlu0 %210  ;;  %v700_v14 = vrot.slane %v1702_v17, 1  ;;  %v689_v59 = vrot.slane %v1704_v12, 7  ;;  %v688_v9 = vrot.slane %v1702_v17, 7  ;;  %v701_v37 = vrot.slane %v1704_v12, 1 }
 0x2a4   :  { %v703_v35 = vsel %vm121_vm1, %v699_v46, %v700_v14  ;;  %v693_v54 = vsel %vm108_vm0, %v689_v59, %v686_v11  ;;  %v705_v62 = vsel %vm121_vm1, %v701_v37, %v698_v47  ;;  %v1746_v16 = vsel %vm108_vm0, %v688_v9, %v689_v59 }
 0x2a5   :  { %v1737_v20 = vsel %vm1066_vm2, %v1692_v13, %v703_v35  ;;  %v1742_v8 = vsel %vm1072_vm3, %v1690_v42, %v693_v54  ;;  %v1757_v35 = vsel %vm1078_vm4, %v1704_v12, %v705_v62  ;;  %v691_v54 = vsel %vm108_vm0, %v687_v48, %v688_v9 }
 0x2a6   :  { %v221_v38 = vpop.permute.xlu1 %220  ;;  %796 = vrot.lane.b32.xlu1 %v1692_v13, %s999_s0  ;;  %794 = vrot.lane.b32.xlu0 %v1690_v42, %s999_s0  ;;  %v219_v41 = vpop.permute.xlu0 %218  ;;  %v1788_v11 = vsel %vm121_vm1, %v700_v14, %v701_v37  ;;  %v216_v9 = vsel %vm1110_vm6, %v1572_v30, %v211_v33  ;;  %v2322_v33 = vmax.f32 %v1346_v60, %v1350_v61 }
 0x2a7   :  { %v227_v15 = vsel %vm1114_vm7, %v1556_v58, %v221_v38  ;;  %v226_v6 = vsel %vm1114_vm7, %v1550_v36, %v219_v41  ;;  %v1771_v38 = vsel %vm121_vm1, %v698_v47, %v699_v46  ;;  %v217_v47 = vsel %vm1110_vm6, %v1566_v21, %v213_v53 }
 0x2a8   :  { %v1761_v24 = vmax.f32 %v215_v49, %v227_v15  ;;  %v1763_v59 = vmax.f32 %v214_v18, %v226_v6  ;;  %v1784_v6 = vsel %vm1084_vm5, %v1702_v17, %v691_v54  ;;  %v2321_v53 = vmax.f32 %v1314_v52, %v1329_v55 }
 0x2a9   :  { %v1818_v54 = vmax.f32 %v2322_v33, %v1286_v25  ;;  %v2323_v52 = vmax.f32 %v1443_v63, %v1448_v1  ;;  %v2324_v60 = vmax.f32 %v1439_v56, %v1424_v45  ;;  %v2326_v63 = vmax.f32 %v1453_v10, %v1434_v51  ;;  %v2327_v10 = vld [vmem:[#allocation21_spill] sm:$0xff]  ;;  %v2354_v44 = vld [vmem:[#allocation23_spill] sm:$0xff] }
 0x2aa   :  { %v225_v36 = vpop.permute.xlu1 %224  ;;  %800 = vrot.lane.b32.xlu1 %v1704_v12, %s999_s0  ;;  %798 = vrot.lane.b32.xlu0 %v1702_v17, %s999_s0  ;;  %v223_v15 = vpop.permute.xlu0 %222  ;;  %v1812_v49 = vmax.f32 %v2321_v53, %v1288_v28  ;;  %v578_v45 = vmax.f32 %v1617_v50, %v1630_v57  ;;  %v579_v51 = vmax.f32 %v1636_v22, %v1622_v39  ;;  %v2330_v39 = vld [vmem:[#allocation19_spill] sm:$0xff]  ;;  %v2331_v22 = vld [vmem:[#allocation18_spill] sm:$0xff] }
 0x2ab   :  { %v229_v48 = vsel %vm1114_vm7, %v1566_v21, %v225_v36  ;;  %v228_v14 = vsel %vm1114_vm7, %v1572_v30, %v223_v15  ;;  %v1838_v55 = vmax.f32 %v2323_v52, %v1394_v4  ;;  %v1844_v61 = vmax.f32 %v2324_v60, %v1396_v3 }
 0x2ac   :  { %v1804_v37 = vmax.f32 %v217_v47, %v229_v48  ;;  %v1806_v18 = vmax.f32 %v216_v9, %v228_v14  ;;  %v2325_v15 = vmax.f32 %v1465_v7, %v1474_v19  ;;  %v1860_v1 = vmax.f32 %v2326_v63, %v1410_v0  ;;  %v2328_v19 = vld [vmem:[#allocation17_spill] sm:$0xff]  ;;  %v2329_v48 = vld [vmem:[#allocation16_spill] sm:$0xff] }
 0x2ad   :  { %v580_v56 = vmax.f32 %v1647_v23, %v1640_v27  ;;  %v581_v7 = vmax.f32 %v2327_v10, %v1656_v40  ;;  %v1883_v9 = vmax.f32 %v579_v51, %v2328_v19  ;;  %v1886_v50 = vmax.f32 %v578_v45, %v2329_v48 }
 0x2ae   :  { %328 = vrot.lane.b32.xlu1 %v1812_v49, %s998_s20  ;;  %326 = vrot.lane.b32.xlu0 %v1818_v54, %s998_s20  ;;  %v1854_v47 = vmax.f32 %v2325_v15, %v1408_v2  ;;  %v711_v23 = vmax.f32 %v1767_v26, %v1737_v20  ;;  %v710_v40 = vmax.f32 %v1742_v8, %v1771_v38  ;;  %v1946_v63 = vpop.permute.xlu1 %324  ;;  %v1948_v45 = vpop.permute.xlu0 %322 }
 0x2af   :  { %v1893_v57 = vmax.f32 %v581_v7, %v2330_v39  ;;  %v1896_v27 = vmax.f32 %v580_v56, %v2331_v22  ;;  %v713_v33 = vmax.f32 %v1746_v16, %v1757_v35  ;;  %v712_v52 = vmax.f32 %v1784_v6, %v1788_v11 }
 0x2b0   :  { %v1915_v14 = vmax.f32 %v711_v23, %v1692_v13  ;;  %v1918_v53 = vmax.f32 %v710_v40, %v1690_v42  ;;  %v2333_v39 = vmin.f32 %v1767_v26, %v1737_v20 }
 0x2b1   :  { %v1929_v60 = vmax.f32 %v713_v33, %v1704_v12  ;;  %v1932_v15 = vmax.f32 %v712_v52, %v1702_v17 }
 0x2b2   :  { %336 = vrot.lane.b32.xlu1 %v1590_v32, %s999_s0  ;;  %334 = vrot.lane.b32.xlu0 %v1596_v34, %s999_s0  ;;  %v779_v22 = vmin.f32 %v2333_v39, %v1692_v13 }
 0x2b3   :  { %2332 = vst [vmem:[#allocation21_spill] sm:$0xff] %v1929_v60 }
 0x2b6   :  { %340 = vrot.lane.b32.xlu1 %v1812_v49, %s999_s0  ;;  %338 = vrot.lane.b32.xlu0 %v1818_v54, %s999_s0 }
 0x2ba   :  { %456 = vrot.lane.b32.xlu1 %v1838_v55, %s998_s20  ;;  %454 = vrot.lane.b32.xlu0 %v1844_v61, %s998_s20 }
 0x2be   :  { %460 = vrot.lane.b32.xlu1 %v1854_v47, %s998_s20  ;;  %458 = vrot.lane.b32.xlu0 %v1860_v1, %s998_s20 }
 0x2c2   :  { %468 = vrot.lane.b32.xlu1 %v1838_v55, %s999_s0  ;;  %466 = vrot.lane.b32.xlu0 %v1844_v61, %s999_s0 }
 0x2c6   :  { %472 = vrot.lane.b32.xlu1 %v1854_v47, %s999_s0  ;;  %470 = vrot.lane.b32.xlu0 %v1860_v1, %s999_s0 }
 0x2ca   :  { %588 = vrot.lane.b32.xlu1 %v1883_v9, %s998_s20  ;;  %586 = vrot.lane.b32.xlu0 %v1886_v50, %s998_s20 }
 0x2ce   :  { %592 = vrot.lane.b32.xlu1 %v1893_v57, %s998_s20  ;;  %590 = vrot.lane.b32.xlu0 %v1896_v27, %s998_s20 }
 0x2d2   :  { %600 = vrot.lane.b32.xlu1 %v1883_v9, %s999_s0  ;;  %598 = vrot.lane.b32.xlu0 %v1886_v50, %s999_s0 }
 0x2d6   :  { %604 = vrot.lane.b32.xlu1 %v1893_v57, %s999_s0  ;;  %602 = vrot.lane.b32.xlu0 %v1896_v27, %s999_s0 }
 0x2da   :  { %720 = vrot.lane.b32.xlu1 %v1915_v14, %s998_s20  ;;  %718 = vrot.lane.b32.xlu0 %v1918_v53, %s998_s20 }
 0x2de   :  { %724 = vrot.lane.b32.xlu1 %v1929_v60, %s998_s20  ;;  %722 = vrot.lane.b32.xlu0 %v1932_v15, %s998_s20 }
 0x2e2   :  { %732 = vrot.lane.b32.xlu1 %v1915_v14, %s999_s0  ;;  %730 = vrot.lane.b32.xlu0 %v1918_v53, %s999_s0 }
 0x2e6   :  { %736 = vrot.lane.b32.xlu1 %v1929_v60, %s999_s0  ;;  %734 = vrot.lane.b32.xlu0 %v1932_v15, %s999_s0 }
 0x310   :  { %v785_v51 = vpop.permute.xlu1 %784  ;;  %v783_v56 = vpop.permute.xlu0 %782 }
 0x311   :  { %v791_v33 = vsel %vm1110_vm6, %v1692_v13, %v785_v51  ;;  %v790_v52 = vsel %vm1110_vm6, %v1690_v42, %v783_v56  ;;  %v2334_v56 = vmin.f32 %v1742_v8, %v1771_v38 }
 0x313   :  { %v778_v48 = vmin.f32 %v2334_v56, %v1690_v42 }
 0x314   :  { %v789_v10 = vpop.permute.xlu1 %788  ;;  %v787_v7 = vpop.permute.xlu0 %786 }
 0x315   :  { %v792_v26 = vsel %vm1110_vm6, %v1702_v17, %v787_v7  ;;  %v2335_v7 = vmin.f32 %v1746_v16, %v1757_v35 }
 0x318   :  { %v797_v23 = vpop.permute.xlu1 %796  ;;  %v795_v40 = vpop.permute.xlu0 %794 }
 0x319   :  { %v803_v36 = vsel %vm1114_vm7, %v1692_v13, %v797_v23  ;;  %v802_v46 = vsel %vm1114_vm7, %v1690_v42, %v795_v40 }
 0x31a   :  { %v807_v62 = vmin.f32 %v791_v33, %v803_v36  ;;  %v806_v41 = vmin.f32 %v790_v52, %v802_v46  ;;  %v793_v46 = vsel %vm1110_vm6, %v1704_v12, %v789_v10  ;;  %v781_v52 = vmin.f32 %v2335_v7, %v1704_v12 }
 0x31c   :  { %v811_v51 = vmin.f32 %v807_v62, %v1692_v13  ;;  %v810_v23 = vmin.f32 %v806_v41, %v1690_v42  ;;  %v801_v19 = vpop.permute.xlu1 %800  ;;  %v799_v60 = vpop.permute.xlu0 %798 }
 0x31d   :  { %v805_v20 = vsel %vm1114_vm7, %v1704_v12, %v801_v19  ;;  %v804_v8 = vsel %vm1114_vm7, %v1702_v17, %v799_v60  ;;  %v2336_v19 = vmin.f32 %v1784_v6, %v1788_v11 }
 0x31e   :  { %v815_v38 = vmin.f32 %v779_v22, %v811_v51  ;;  %v814_v41 = vmin.f32 %v778_v48, %v810_v23  ;;  %v809_v62 = vmin.f32 %v793_v46, %v805_v20  ;;  %v808_v36 = vmin.f32 %v792_v26, %v804_v8 }
 0x31f   :  { %v780_v60 = vmin.f32 %v2336_v19, %v1702_v17 }
 0x320   :  { %v819_v39 = vrot.slane %v815_v38, 7  ;;  %v831_v40 = vrot.slane %v815_v38, 1  ;;  %v818_v33 = vrot.slane %v814_v41, 7  ;;  %v830_v10 = vrot.slane %v814_v41, 1  ;;  %v327_v5 = vpop.permute.xlu0 %326 }
 0x321   :  { %v813_v56 = vmin.f32 %v809_v62, %v1704_v12  ;;  %v812_v48 = vmin.f32 %v808_v36, %v1702_v17 }
 0x322   :  { %v836_v22 = vsel %vm121_vm1, %v830_v10, %v831_v40  ;;  %v824_v51 = vsel %vm108_vm0, %v818_v33, %v819_v39 }
 0x323   :  { %v817_v23 = vmin.f32 %v781_v52, %v813_v56  ;;  %v816_v46 = vmin.f32 %v780_v60, %v812_v48 }
 0x325   :  { %v821_v26 = vrot.slane %v817_v23, 7  ;;  %v833_v16 = vrot.slane %v817_v23, 1  ;;  %v820_v35 = vrot.slane %v816_v46, 7  ;;  %v832_v20 = vrot.slane %v816_v46, 1 }
 0x327   :  { %v837_v8 = vsel %vm121_vm1, %v833_v16, %v830_v10  ;;  %v823_v6 = vsel %vm108_vm0, %v819_v39, %v820_v35  ;;  %v825_v36 = vsel %vm108_vm0, %v821_v26, %v818_v33  ;;  %v835_v7 = vsel %vm121_vm1, %v831_v40, %v832_v20 }
 0x328   :  { %v841_v11 = vsel %vm1078_vm4, %v817_v23, %v837_v8  ;;  %v828_v62 = vsel %vm1084_vm5, %v816_v46, %v823_v6  ;;  %v826_v56 = vsel %vm1072_vm3, %v814_v41, %v825_v36  ;;  %v839_v10 = vsel %vm1066_vm2, %v815_v38, %v835_v7 }
 0x329   :  { %v842_v60 = vmax.f32 %v826_v56, %v836_v22  ;;  %v843_v39 = vmax.f32 %v824_v51, %v839_v10  ;;  %v834_v29 = vsel %vm121_vm1, %v832_v20, %v833_v16  ;;  %v822_v31 = vsel %vm108_vm0, %v820_v35, %v821_v26 }
 0x32a   :  { %v844_v40 = vmax.f32 %v828_v62, %v834_v29  ;;  %v845_v8 = vmax.f32 %v822_v31, %v841_v11  ;;  %v331_v10 = vsel %vm1110_vm6, %v1590_v32, %v1946_v63 }
 0x32b   :  { %v2018_v48 = vmax.f32 %v842_v60, %v814_v41  ;;  %v2020_v33 = vmax.f32 %v843_v39, %v815_v38  ;;  %v329_v38 = vpop.permute.xlu1 %328  ;;  %v335_v41 = vpop.permute.xlu0 %334  ;;  %v330_v60 = vsel %vm1110_vm6, %v1596_v34, %v1948_v45  ;;  %v235_v45 = vmax.f32 %v1761_v24, %v1556_v58  ;;  %v2340_v58 = vld [vmem:[#allocation10_spill] sm:$0xff] }
 0x32c   :  { %v2026_v22 = vmax.f32 %v844_v40, %v816_v46  ;;  %v2028_v51 = vmax.f32 %v845_v8, %v817_v23  ;;  %v342_v56 = vsel %vm1114_vm7, %v1596_v34, %v335_v41  ;;  %v332_v8 = vsel %vm1110_vm6, %v1818_v54, %v327_v5 }
 0x32d   :  { %850 = vrot.lane.b32.xlu0 %v2018_v48, %s998_s20  ;;  %852 = vrot.lane.b32.xlu1 %v2020_v33, %s998_s20  ;;  %v346_v31 = vmax.f32 %v330_v60, %v342_v56  ;;  %v2339_v60 = vld [vmem:[#allocation20_spill] sm:$0xff] }
 0x32f   :  { %v337_v23 = vpop.permute.xlu1 %336  ;;  %v339_v46 = vpop.permute.xlu0 %338 }
 0x330   :  { %v343_v52 = vsel %vm1114_vm7, %v1590_v32, %v337_v23  ;;  %v344_v40 = vsel %vm1114_vm7, %v1818_v54, %v339_v46  ;;  %v333_v23 = vsel %vm1110_vm6, %v1812_v49, %v329_v38  ;;  %v350_v46 = vmax.f32 %v346_v31, %v1596_v34  ;;  %v2341_v38 = vld [vmem:[#allocation11_spill] sm:$0xff] }
 0x331   :  { %854 = vrot.lane.b32.xlu0 %v2026_v22, %s998_s20  ;;  %856 = vrot.lane.b32.xlu1 %v2028_v51, %s998_s20  ;;  %v347_v29 = vmax.f32 %v331_v10, %v343_v52  ;;  %v348_v41 = vmax.f32 %v332_v8, %v344_v40  ;;  %v943_v8 = vld [vmem:[#allocation2 + $0x8] sm:$0xff] }
 0x332   :  { %v2089_v24 = vsub.f32 %v943_v8, %v235_v45  ;;  %v354_v17 = vsub.f32 %v2341_v38, %v350_v46  ;;  %v2106_v46 = vld [vmem:[#allocation2 + $0x10] sm:$0xff] }
 0x333   :  { %v341_v26 = vpop.permute.xlu1 %340  ;;  %v455_v16 = vpop.permute.xlu0 %454  ;;  %v351_v52 = vmax.f32 %v347_v29, %v1590_v32  ;;  %v352_v40 = vmax.f32 %v348_v41, %v1818_v54  ;;  %v236_v32 = vmax.f32 %v1806_v18, %v1572_v30  ;;  %v944_v29 = vld [vmem:[#allocation2] sm:$0xff]  ;;  %2343 = vst [vmem:[#allocation9_spill] sm:$0xff] %v2106_v46 }
 0x334   :  { %v345_v63 = vsel %vm1114_vm7, %v1812_v49, %v341_v26  ;;  %v234_v26 = vmax.f32 %v1763_v59, %v2339_v60  ;;  %v237_v59 = vmax.f32 %v1804_v37, %v1566_v21  ;;  %v243_v30 = vmax.f32 %v2089_v24, 0.0  ;;  %v2344_v21 = vld [vmem:[#allocation12_spill] sm:$0xff] }
 0x335   :  { %862 = vrot.lane.b32.xlu0 %v2018_v48, %s999_s0  ;;  %864 = vrot.lane.b32.xlu1 %v2020_v33, %s999_s0  ;;  %v349_v10 = vmax.f32 %v333_v23, %v345_v63  ;;  %v355_v12 = vsub.f32 %v2340_v58, %v351_v52  ;;  %v2342_v23 = vld [vmem:[#allocation13_spill] sm:$0xff] }
 0x336   :  { %v238_v31 = vsub.f32 %v944_v29, %v234_v26  ;;  %v356_v54 = vsub.f32 %v2342_v23, %v352_v40 }
 0x337   :  { %v457_v35 = vpop.permute.xlu1 %456  ;;  %v2042_v20 = vpop.permute.xlu0 %458  ;;  %v353_v34 = vmax.f32 %v349_v10, %v1812_v49  ;;  %v359_v18 = vmax.f32 %v355_v12, 0.0  ;;  %v358_v49 = vmax.f32 %v354_v17, 0.0  ;;  %v240_v10 = vsub.f32 %v2106_v46, %v236_v32  ;;  %v2119_v12 = vld [vmem:[#allocation2 + $0x18] sm:$0xff] }
 0x338   :  { %v463_v60 = vsel %vm1110_vm6, %v1838_v55, %v457_v35  ;;  %2345 = vst [vmem:[#allocation8_spill] sm:$0xff] %v2119_v12  ;;  %v241_v8 = vsub.f32 %v2119_v12, %v237_v59  ;;  %v360_v24 = vmax.f32 %v356_v54, 0.0  ;;  %v464_v35 = vsel %vm1110_vm6, %v1860_v1, %v2042_v20 }
 0x339   :  { %866 = vrot.lane.b32.xlu0 %v2026_v22, %s999_s0  ;;  %868 = vrot.lane.b32.xlu1 %v2028_v51, %s999_s0  ;;  %v357_v37 = vsub.f32 %v2344_v21, %v353_v34  ;;  %v363_v58 = vmul.f32 %v359_v18, %v243_v30  ;;  %v244_v34 = vmax.f32 %v240_v10, 0.0 }
 0x33a   :  { %v245_v20 = vmax.f32 %v241_v8, 0.0 }
 0x33b   :  { %v2044_v6 = vpop.permute.xlu1 %460  ;;  %v467_v11 = vpop.permute.xlu0 %466  ;;  %v367_v21 = vsub.f32 %v359_v18, %v363_v58 }
 0x33c   :  { %v474_v45 = vsel %vm1114_vm7, %v1844_v61, %v467_v11  ;;  %v242_v11 = vmax.f32 %v238_v31, 0.0  ;;  %v465_v59 = vsel %vm1110_vm6, %v1854_v47, %v2044_v6 }
 0x33e   :  { %v362_v38 = vmul.f32 %v358_v49, %v242_v11 }
 0x33f   :  { %v469_v62 = vpop.permute.xlu1 %468  ;;  %v471_v36 = vpop.permute.xlu0 %470 }
 0x340   :  { %v475_v41 = vsel %vm1114_vm7, %v1838_v55, %v469_v62  ;;  %v462_v62 = vsel %vm1110_vm6, %v1844_v61, %v455_v16  ;;  %v476_v17 = vsel %vm1114_vm7, %v1860_v1, %v471_v36  ;;  %v361_v36 = vmax.f32 %v357_v37, 0.0  ;;  %v2346_v37 = vld [vmem:[#allocation15_spill] sm:$0xff] }
 0x341   :  { %v479_v26 = vmax.f32 %v463_v60, %v475_v41  ;;  %v478_v40 = vmax.f32 %v462_v62, %v474_v45  ;;  %v480_v29 = vmax.f32 %v464_v35, %v476_v17  ;;  %v364_v41 = vmul.f32 %v360_v24, %v244_v34  ;;  %v2347_v17 = vld [vmem:[#allocation14_spill] sm:$0xff] }
 0x342   :  { %v366_v60 = vsub.f32 %v358_v49, %v362_v38 }
 0x343   :  { %v2046_v7 = vpop.permute.xlu1 %472  ;;  %v2054_v19 = vpop.permute.xlu0 %586  ;;  %v483_v23 = vmax.f32 %v479_v26, %v1838_v55  ;;  %v482_v54 = vmax.f32 %v478_v40, %v1844_v61  ;;  %v484_v10 = vmax.f32 %v480_v29, %v1860_v1  ;;  %v368_v46 = vsub.f32 %v360_v24, %v364_v41 }
 0x344   :  { %v477_v16 = vsel %vm1114_vm7, %v1854_v47, %v2046_v7  ;;  %v365_v7 = vmul.f32 %v361_v36, %v245_v20  ;;  %v371_v26 = vmax.f32 %v367_v21, 0.0  ;;  %v370_v61 = vmax.f32 %v366_v60, 0.0 }
 0x345   :  { %v481_v45 = vmax.f32 %v465_v59, %v477_v16  ;;  %v487_v62 = vsub.f32 %v2346_v37, %v483_v23  ;;  %v486_v35 = vsub.f32 %v2347_v17, %v482_v54  ;;  %v488_v8 = vsub.f32 %v1286_v25, %v484_v10 }
 0x346   :  { %v369_v40 = vsub.f32 %v361_v36, %v365_v7  ;;  %v372_v38 = vmax.f32 %v368_v46, 0.0  ;;  %v594_v25 = vsel %vm1110_vm6, %v1886_v50, %v2054_v19  ;;  %v374_v16 = vadd.f32 %v370_v61, %v242_v11 }
 0x347   :  { %v2064_v39 = vpop.permute.xlu1 %588  ;;  %v2082_v56 = vpop.permute.xlu0 %590  ;;  %v485_v6 = vmax.f32 %v481_v45, %v1854_v47  ;;  %v491_v49 = vmax.f32 %v487_v62, 0.0  ;;  %v490_v58 = vmax.f32 %v486_v35, 0.0  ;;  %v492_v23 = vmax.f32 %v488_v8, 0.0 }
 0x348   :  { %v595_v47 = vsel %vm1110_vm6, %v1883_v9, %v2064_v39  ;;  %v373_v59 = vmax.f32 %v369_v40, 0.0  ;;  %v376_v19 = vadd.f32 %v372_v38, %v244_v34 }
 0x349   :  { %v489_v24 = vsub.f32 %v1288_v28, %v485_v6  ;;  %v494_v41 = vmul.f32 %v490_v58, %v374_v16 }
 0x34a   :  { %v377_v7 = vadd.f32 %v373_v59, %v245_v20  ;;  %v496_v10 = vmul.f32 %v492_v23, %v376_v19 }
 0x34b   :  { %v2084_v5 = vpop.permute.xlu1 %592  ;;  %v599_v63 = vpop.permute.xlu0 %598  ;;  %v493_v45 = vmax.f32 %v489_v24, 0.0  ;;  %v498_v34 = vsub.f32 %v490_v58, %v494_v41 }
 0x34c   :  { %v606_v1 = vsel %vm1114_vm7, %v1886_v50, %v599_v63  ;;  %v597_v11 = vsel %vm1110_vm6, %v1893_v57, %v2084_v5  ;;  %v500_v5 = vsub.f32 %v492_v23, %v496_v10 }
 0x34d   :  { %v610_v29 = vmax.f32 %v594_v25, %v606_v1  ;;  %v497_v17 = vmul.f32 %v493_v45, %v377_v7 }
 0x34f   :  { %v601_v52 = vpop.permute.xlu1 %600  ;;  %v603_v32 = vpop.permute.xlu0 %602  ;;  %v614_v21 = vmax.f32 %v610_v29, %v1886_v50  ;;  %v502_v50 = vmax.f32 %v498_v34, 0.0  ;;  %v501_v40 = vsub.f32 %v493_v45, %v497_v17 }
 0x350   :  { %v607_v18 = vsel %vm1114_vm7, %v1883_v9, %v601_v52  ;;  %v375_v52 = vadd.f32 %v371_v26, %v243_v30  ;;  %v608_v28 = vsel %vm1114_vm7, %v1896_v27, %v603_v32  ;;  %v596_v30 = vsel %vm1110_vm6, %v1896_v27, %v2082_v56 }
 0x351   :  { %v611_v36 = vmax.f32 %v595_v47, %v607_v18  ;;  %v612_v60 = vmax.f32 %v596_v30, %v608_v28  ;;  %v618_v6 = vsub.f32 %v1396_v3, %v614_v21  ;;  %v506_v47 = vadd.f32 %v502_v50, %v374_v16  ;;  %v2348_v28 = vld [vmem:[#allocation21_spill] sm:$0xff] }
 0x352   :  { %v495_v54 = vmul.f32 %v491_v49, %v375_v52  ;;  %v505_v29 = vmax.f32 %v501_v40, 0.0 }
 0x353   :  { %v605_v31 = vpop.permute.xlu1 %604  ;;  %v2139_v12 = vpop.permute.xlu0 %718  ;;  %v615_v32 = vmax.f32 %v611_v36, %v1883_v9  ;;  %v616_v26 = vmax.f32 %v612_v60, %v1896_v27  ;;  %v504_v27 = vmax.f32 %v500_v5, 0.0  ;;  %v2352_v5 = vld [vmem:[#allocation19_spill] sm:$0xff] }
 0x354   :  { %v609_v39 = vsel %vm1114_vm7, %v1893_v57, %v605_v31  ;;  %v499_v37 = vsub.f32 %v491_v49, %v495_v54  ;;  %v726_v58 = vsel %vm1110_vm6, %v1918_v53, %v2139_v12  ;;  %v509_v30 = vadd.f32 %v505_v29, %v377_v7  ;;  %v2351_v7 = vld [vmem:[#allocation18_spill] sm:$0xff] }
 0x355   :  { %v613_v31 = vmax.f32 %v597_v11, %v609_v39  ;;  %v619_v56 = vsub.f32 %v1394_v4, %v615_v32  ;;  %v622_v4 = vmax.f32 %v618_v6, 0.0  ;;  %v620_v3 = vsub.f32 %v1410_v0, %v616_v26 }
 0x356   :  { %v503_v61 = vmax.f32 %v499_v37, 0.0  ;;  %v508_v41 = vadd.f32 %v504_v27, %v376_v19  ;;  %v2349_v19 = vld [vmem:[#allocation17_spill] sm:$0xff]  ;;  %v2350_v37 = vld [vmem:[#allocation16_spill] sm:$0xff] }
 0x357   :  { %v721_v55 = vpop.permute.xlu1 %720  ;;  %v723_v63 = vpop.permute.xlu0 %722  ;;  %v617_v9 = vmax.f32 %v613_v31, %v1893_v57  ;;  %v623_v18 = vmax.f32 %v619_v56, 0.0  ;;  %v626_v59 = vmul.f32 %v622_v4, %v506_v47  ;;  %v624_v23 = vmax.f32 %v620_v3, 0.0 }
 0x358   :  { %v727_v57 = vsel %vm1110_vm6, %v1915_v14, %v721_v55  ;;  %v507_v24 = vadd.f32 %v503_v61, %v375_v52  ;;  %v728_v12 = vsel %vm1110_vm6, %v1932_v15, %v723_v63 }
 0x359   :  { %v621_v49 = vsub.f32 %v1408_v2, %v617_v9  ;;  %v630_v21 = vsub.f32 %v622_v4, %v626_v59  ;;  %v628_v60 = vmul.f32 %v624_v23, %v508_v41 }
 0x35a   :  { %v627_v2 = vmul.f32 %v623_v18, %v507_v24 }
 0x35b   :  { %v725_v46 = vpop.permute.xlu1 %724  ;;  %v731_v62 = vpop.permute.xlu0 %730  ;;  %v625_v54 = vmax.f32 %v621_v49, 0.0  ;;  %v634_v17 = vmax.f32 %v630_v21, 0.0 }
 0x35c   :  { %v738_v8 = vsel %vm1114_vm7, %v1918_v53, %v731_v62  ;;  %v729_v52 = vsel %vm1110_vm6, %v2348_v28, %v725_v46  ;;  %v631_v32 = vsub.f32 %v623_v18, %v627_v2 }
 0x35d   :  { %v742_v36 = vmax.f32 %v726_v58, %v738_v8  ;;  %v629_v10 = vmul.f32 %v625_v54, %v509_v30 }
 0x35e   :  { %v635_v46 = vmax.f32 %v631_v32, 0.0 }
 0x35f   :  { %v733_v35 = vpop.permute.xlu1 %732  ;;  %v735_v1 = vpop.permute.xlu0 %734  ;;  %v746_v39 = vmax.f32 %v742_v36, %v1918_v53 }
 0x360   :  { %v739_v20 = vsel %vm1114_vm7, %v1915_v14, %v733_v35  ;;  %v740_v0 = vsel %vm1114_vm7, %v1932_v15, %v735_v1  ;;  %v633_v35 = vsub.f32 %v625_v54, %v629_v10  ;;  %v639_v40 = vadd.f32 %v635_v46, %v507_v24 }
 0x361   :  { %v743_v25 = vmax.f32 %v727_v57, %v739_v20  ;;  %v744_v45 = vmax.f32 %v728_v12, %v740_v0  ;;  %v750_v34 = vsub.f32 %v2350_v37, %v746_v39  ;;  %v638_v20 = vadd.f32 %v634_v17, %v506_v47 }
 0x362   :  { %v637_v8 = vmax.f32 %v633_v35, 0.0 }
 0x363   :  { %v737_v38 = vpop.permute.xlu1 %736  ;;  %v747_v16 = vmax.f32 %v743_v25, %v1915_v14  ;;  %v748_v63 = vmax.f32 %v744_v45, %v1932_v15  ;;  %v632_v14 = vsub.f32 %v624_v23, %v628_v60  ;;  %v754_v56 = vmax.f32 %v750_v34, 0.0 }
 0x364   :  { %v741_v55 = vsel %vm1114_vm7, %v2348_v28, %v737_v38  ;;  %v641_v57 = vadd.f32 %v637_v8, %v509_v30 }
 0x365   :  { %v745_v11 = vmax.f32 %v729_v52, %v741_v55  ;;  %v751_v31 = vsub.f32 %v2349_v19, %v747_v16  ;;  %v752_v6 = vsub.f32 %v2351_v7, %v748_v63  ;;  %v636_v50 = vmax.f32 %v632_v14, 0.0 }
 0x366   :  { %v758_v15 = vmul.f32 %v754_v56, %v638_v20 }
 0x367   :  { %v749_v62 = vmax.f32 %v745_v11, %v2348_v28  ;;  %v755_v53 = vmax.f32 %v751_v31, 0.0  ;;  %v756_v4 = vmax.f32 %v752_v6, 0.0  ;;  %v640_v49 = vadd.f32 %v636_v50, %v508_v41 }
 0x368   :  { %v762_v38 = vsub.f32 %v754_v56, %v758_v15  ;;  %v2355_v15 = vld [vmem:[#allocation9_spill] sm:$0xff] }
 0x369   :  { %v753_v9 = vsub.f32 %v2352_v5, %v749_v62  ;;  %v759_v18 = vmul.f32 %v755_v53, %v639_v40  ;;  %v760_v25 = vmul.f32 %v756_v4, %v640_v49 }
 0x36a   :  { %v766_v54 = vmax.f32 %v762_v38, 0.0 }
 0x36b   :  { %v757_v1 = vmax.f32 %v753_v9, 0.0  ;;  %v763_v58 = vsub.f32 %v755_v53, %v759_v18  ;;  %v764_v41 = vsub.f32 %v756_v4, %v760_v25  ;;  %v907_v25 = vld [vmem:[#allocation2 + $0x8] sm:$0xff] }
 0x36c   :  { %v770_v31 = vadd.f32 %v766_v54, %v638_v20 }
 0x36d   :  { %v761_v29 = vmul.f32 %v757_v1, %v641_v57  ;;  %v767_v55 = vmax.f32 %v763_v58, 0.0 }
 0x36f   :  { %v765_v16 = vsub.f32 %v757_v1, %v761_v29  ;;  %v771_v62 = vadd.f32 %v767_v55, %v639_v40  ;;  %v906_v1 = vld [vmem:[#allocation2] sm:$0xff] }
 0x371   :  { %v769_v63 = vmax.f32 %v765_v16, 0.0 }
 0x39f   :  { %v851_v26 = vpop.permute.xlu0 %850  ;;  %v853_v61 = vpop.permute.xlu1 %852 }
 0x3a0   :  { %v858_v0 = vsel %vm1110_vm6, %v2018_v48, %v851_v26  ;;  %v859_v2 = vsel %vm1110_vm6, %v2020_v33, %v853_v61  ;;  %v773_v26 = vadd.f32 %v769_v63, %v641_v57 }
 0x3a3   :  { %v855_v3 = vpop.permute.xlu0 %854  ;;  %v857_v27 = vpop.permute.xlu1 %856 }
 0x3a4   :  { %v860_v39 = vsel %vm1110_vm6, %v2026_v22, %v855_v3  ;;  %v861_v32 = vsel %vm1110_vm6, %v2028_v51, %v857_v27  ;;  %v2356_v27 = vld [vmem:[#allocation8_spill] sm:$0xff] }
 0x3a7   :  { %v863_v36 = vpop.permute.xlu0 %862  ;;  %v865_v24 = vpop.permute.xlu1 %864 }
 0x3a8   :  { %v870_v47 = vsel %vm1114_vm7, %v2018_v48, %v863_v36  ;;  %v871_v59 = vsel %vm1114_vm7, %v2020_v33, %v865_v24 }
 0x3a9   :  { %v874_v23 = vmax.f32 %v858_v0, %v870_v47  ;;  %v875_v28 = vmax.f32 %v859_v2, %v871_v59 }
 0x3ab   :  { %v878_v12 = vmax.f32 %v874_v23, %v2018_v48  ;;  %v867_v52 = vpop.permute.xlu0 %866  ;;  %v879_v45 = vmax.f32 %v875_v28, %v2020_v33  ;;  %v869_v30 = vpop.permute.xlu1 %868  ;;  %v768_v33 = vmax.f32 %v764_v41, 0.0 }
 0x3ac   :  { %v872_v11 = vsel %vm1114_vm7, %v2026_v22, %v867_v52  ;;  %v873_v48 = vsel %vm1114_vm7, %v2028_v51, %v869_v30 }
 0x3ad   :  { %v882_v21 = vsub.f32 %v1690_v42, %v878_v12  ;;  %v876_v60 = vmax.f32 %v860_v39, %v872_v11  ;;  %v883_v10 = vsub.f32 %v1692_v13, %v879_v45  ;;  %v877_v19 = vmax.f32 %v861_v32, %v873_v48  ;;  %v2353_v42 = vld [vmem:[#allocation22_spill] sm:$0xff] }
 0x3ae   :  { %v772_v7 = vadd.f32 %v768_v33, %v640_v49 }
 0x3af   :  { %v886_v37 = vmax.f32 %v882_v21, 0.0  ;;  %v880_v34 = vmax.f32 %v876_v60, %v2026_v22  ;;  %v887_v46 = vmax.f32 %v883_v10, 0.0  ;;  %v881_v43 = vmax.f32 %v877_v19, %v2028_v51 }
 0x3b1   :  { %v890_v17 = vmul.f32 %v886_v37, %v770_v31  ;;  %v884_v14 = vsub.f32 %v2353_v42, %v880_v34  ;;  %v891_v35 = vmul.f32 %v887_v46, %v771_v62  ;;  %v885_v53 = vsub.f32 %v2354_v44, %v881_v43 }
 0x3b3   :  { %v894_v56 = vsub.f32 %v886_v37, %v890_v17  ;;  %v888_v13 = vmax.f32 %v884_v14, 0.0  ;;  %v895_v6 = vsub.f32 %v887_v46, %v891_v35  ;;  %v889_v5 = vmax.f32 %v885_v53, 0.0 }
 0x3b5   :  { %v898_v9 = vmax.f32 %v894_v56, 0.0  ;;  %v892_v61 = vmul.f32 %v888_v13, %v772_v7  ;;  %v899_v22 = vmax.f32 %v895_v6, 0.0  ;;  %v893_v50 = vmul.f32 %v889_v5, %v773_v26 }
 0x3b7   :  { %v902_v40 = vadd.f32 %v898_v9, %v770_v31  ;;  %v896_v20 = vsub.f32 %v888_v13, %v892_v61  ;;  %v903_v8 = vadd.f32 %v899_v22, %v771_v62  ;;  %v897_v51 = vsub.f32 %v889_v5, %v893_v50 }
 0x3b9   :  { %v900_v18 = vmax.f32 %v896_v20, 0.0  ;;  %v908_v4 = vmul.f32 %v2355_v15, %v902_v40  ;;  %v901_v3 = vmax.f32 %v897_v51, 0.0  ;;  %v909_v58 = vmul.f32 %v2356_v27, %v903_v8 }
 0x3ba   :  { %v911_v49 = vadd.f32 %v903_v8, %v902_v40 }
 0x3bb   :  { %v904_v38 = vadd.f32 %v900_v18, %v772_v7  ;;  %v905_v57 = vadd.f32 %v901_v3, %v773_v26  ;;  %v910_v36 = vadd.f32 %v909_v58, %v908_v4 }
 0x3bc   :  { %917 = vst [vmem:[#allocation5 + $0x8] sm:$0xff] %v911_v49 }
 0x3bd   :  { %v912_v29 = vmul.f32 %v906_v1, %v904_v38  ;;  %v913_v0 = vmul.f32 %v907_v25, %v905_v57  ;;  %v915_v24 = vadd.f32 %v905_v57, %v904_v38  ;;  %916 = vst [vmem:[#allocation5] sm:$0xff] %v910_v36 }
 0x3bf   :  { %v914_v47 = vadd.f32 %v913_v0, %v912_v29  ;;  %919 = vst [vmem:[#allocation5 + $0x18] sm:$0xff] %v915_v24 }
 0x3c1   :  { %918 = vst [vmem:[#allocation5 + $0x10] sm:$0xff] %v914_v47 }
 0x3c2   :  { %980 = shalt.err (!%p977_p12)
}
 0x3c3   :  { %s981_s26 = scalar_lea.hbm %s2263_s1, 512 }
 0x3c4   :  { %p982_p13 = scmp.ne.s32.totalorder %s2263_s1, %s981_s26  ;;  %p985_p0 = scmp.lt.u32.totalorder %s981_s26, %s2263_s1 }
 0x3c6   :  { %p987_p1 = pnand %p985_p0, %p982_p13 }
 0x3c8   :  { %990 = shalt.err (!%p987_p1)
}
 0x3c9   :  { %931 = dma.vmem_to_hbm [thread:$0]  %s926_s22, 512, %s2263_s1, [#allocation4], %s996_s16, %s996_s16, %s997_s17  }
 0x3ca   :  { %993 = dma.done.wait [#allocation4], 512  }
 0x3cb   :  { %994 = vsyncadd [#allocation4], 4294966784 }
 0x3cc   :  { %935 = vsyncpa [#allocation3], 1 }
 0x3cd   :  { %936 = vsyncpa [#allocation4], 1 }

</bundles_post_ra>
